<compile_context>
chip_gen: v7x
topology: tpu7x:2x2x1
jax: 0.10.0
libtpu: 0.0.40
codegen_flags: <defaults>
</compile_context>

<pallas_src>
import functools
import math

import jax
import jax.numpy as jnp
import numpy as np
from jax import lax
from jax.experimental import pallas as pl
from jax.experimental.pallas import tpu as pltpu


def cross_attn_kernel(*refs, nhead, batch_block, has_qpos, has_pos, compute_dtype):
    # ---- unpack refs (qpos / pos are optional, controlled by static flags) ----
    idx = 0
    tgt_ref = refs[idx]; idx += 1
    qpos_ref = None
    if has_qpos:
        qpos_ref = refs[idx]; idx += 1
    mem_ref = refs[idx]; idx += 1
    pos_ref = None
    if has_pos:
        pos_ref = refs[idx]; idx += 1
    (wq_ref, wk_ref, wv_ref, bq_ref, bk_ref, bv_ref,
     wo_ref, bo_ref, gamma_ref, beta_ref,
     out_ref, qh_scr, m_scr, l_scr, acc_scr) = refs[idx:]

    f32 = jnp.float32
    cdt = compute_dtype
    bb = batch_block
    _, Lq, E = tgt_ref.shape
    tk = mem_ref.shape[1]
    hd = E // nhead
    BH = bb * nhead

    j = pl.program_id(1)
    nk = pl.num_programs(1)

    def split_heads(x2d, L):
        # (bb*L, E) -> (BH, L, hd): static lane slices per head, stacked head-major.
        x3 = x2d.reshape(bb, L, E)
        heads = [x3[:, :, h * hd:(h + 1) * hd] for h in range(nhead)]
        xh = jnp.stack(heads, axis=1)                      # (bb, nhead, L, hd)
        return xh.reshape(BH, L, hd)

    # ---- first k-step: project Q once (full-width matmul), init online-softmax state ----
    @pl.when(j == 0)
    def _():
        q = tgt_ref[...].astype(f32)
        if has_qpos:
            q = q + qpos_ref[...].astype(f32)
        q2 = q.reshape(bb * Lq, E).astype(cdt)
        # 1/sqrt(hd) is folded into wq / bq by the wrapper.
        Q = jnp.dot(q2, wq_ref[...], preferred_element_type=f32) + bq_ref[...]
        qh_scr[...] = split_heads(Q, Lq).astype(qh_scr.dtype)
        m_scr[...] = jnp.full(m_scr.shape, -jnp.inf, dtype=m_scr.dtype)
        l_scr[...] = jnp.zeros(l_scr.shape, dtype=l_scr.dtype)
        acc_scr[...] = jnp.zeros(acc_scr.shape, dtype=acc_scr.dtype)

    # ---- K/V projections for this Lk tile (full-width (bb*tk, E) @ (E, E) matmuls) ----
    mem = mem_ref[...].astype(f32)                         # (bb, tk, E)
    if has_pos:
        k_in = mem + pos_ref[...].astype(f32)
    else:
        k_in = mem
    k2 = k_in.reshape(bb * tk, E).astype(cdt)
    v2 = mem.reshape(bb * tk, E).astype(cdt)
    K = jnp.dot(k2, wk_ref[...], preferred_element_type=f32) + bk_ref[...]
    V = jnp.dot(v2, wv_ref[...], preferred_element_type=f32) + bv_ref[...]
    Kh = split_heads(K, tk).astype(cdt)                    # (BH, tk, hd)
    Vh = split_heads(V, tk).astype(cdt)                    # (BH, tk, hd)

    # ---- online-softmax attention update for this tile ----
    qh = qh_scr[...]                                       # (BH, Lq, hd), compute dtype
    s = jnp.einsum('bqd,bkd->bqk', qh, Kh,
                   preferred_element_type=f32)             # (BH, Lq, tk)
    # TODO(synk): memory_mask / memory_key_padding_mask would be added to `s` here.
    m_prev = m_scr[...]
    m_new = jnp.maximum(m_prev, jnp.max(s, axis=-1, keepdims=True))
    alpha = jnp.exp(m_prev - m_new)
    p = jnp.exp(s - m_new)
    l_scr[...] = alpha * l_scr[...] + jnp.sum(p, axis=-1, keepdims=True)
    acc_scr[...] = alpha * acc_scr[...] + jnp.einsum(
        'bqk,bkd->bqd', p.astype(cdt), Vh, preferred_element_type=f32)
    m_scr[...] = m_new

    # ---- last k-step: normalize, output projection, residual + LayerNorm ----
    @pl.when(j == nk - 1)
    def _():
        o = acc_scr[...] * pl.reciprocal(l_scr[...], approx=True)   # (BH, Lq, hd) f32
        o4 = o.reshape(bb, nhead, Lq, hd)
        o_cat = jnp.concatenate([o4[:, h] for h in range(nhead)], axis=-1)  # (bb, Lq, E)
        o2 = o_cat.reshape(bb * Lq, E).astype(cdt)
        attn = jnp.dot(o2, wo_ref[...], preferred_element_type=f32) + bo_ref[...]
        # residual (dropout = 0.0 -> identity) + LayerNorm, all in f32
        x = tgt_ref[...].astype(f32).reshape(bb * Lq, E) + attn
        mu = jnp.mean(x, axis=-1, keepdims=True)
        xc = x - mu
        var = jnp.mean(xc * xc, axis=-1, keepdims=True)
        y = xc * lax.rsqrt(var + 1e-5)
        y = y * gamma_ref[...] + beta_ref[...]
        out_ref[...] = y.reshape(bb, Lq, E).astype(out_ref.dtype)


def _prepare_attention_params(params, E, nhead, w_dtype):
    """Pack nn.MultiheadAttention params as plain (E, E) / (1, E); fold in 1/sqrt(hd)."""
    hd = E // nhead
    scale = 1.0 / math.sqrt(hd)
    w_in = params['in_proj_weight']          # (3E, E), rows = output features
    b_in = params['in_proj_bias']            # (3E,)
    wq = (w_in[:E].T * scale).astype(w_dtype)
    wk = w_in[E:2 * E].T.astype(w_dtype)
    wv = w_in[2 * E:].T.astype(w_dtype)
    bq = (b_in[:E] * scale).reshape(1, E).astype(jnp.float32)
    bk = b_in[E:2 * E].reshape(1, E).astype(jnp.float32)
    bv = b_in[2 * E:].reshape(1, E).astype(jnp.float32)
    wo = params['out_proj_weight'].T.astype(w_dtype)
    bo = params['out_proj_bias'].reshape(1, E).astype(jnp.float32)
    gamma = params['norm_weight'].reshape(1, E).astype(jnp.float32)
    beta = params['norm_bias'].reshape(1, E).astype(jnp.float32)
    return wq, wk, wv, bq, bk, bv, wo, bo, gamma, beta


def _pick_k_tile(Lk, target):
    """Largest multiple-of-8 tile <= target that divides Lk (else the full Lk)."""
    if Lk <= target:
        return Lk
    t = (min(target, Lk) // 8) * 8
    while t >= 8:
        if Lk % t == 0:
            return t
        t -= 8
    return Lk


def cross_attention_layer(tgt, memory, params, *, nhead, query_pos=None, pos=None,
                          batch_block=None, k_block=512, compute_dtype=None,
                          vmem_limit_bytes=None):
    """forward_post of CrossAttentionLayer (normalize_before=False, dropout=0.0).

    tgt: (Lq, B, E), memory: (Lk, B, E)  ->  (Lq, B, E)
    batch_block: batches per grid step (None -> B; use 1 on v7x for megacore).
    k_block: Lk tile for the flash-style inner axis (size it to the VMEM budget:
             ~40 MiB usable on v7x, more on v5e/v6e).
    compute_dtype: e.g. jnp.bfloat16 on v6e/v7x -> bf16 MXU operands & half K/V DMA
             bytes (dots still accumulate in f32; softmax/LayerNorm stay f32).
    """
    Lq, B, E = tgt.shape
    Lk = memory.shape[0]
    assert E % nhead == 0
    bb = B if batch_block is None else batch_block
    assert B % bb == 0, "batch_block must divide the batch size"
    hd = E // nhead
    tk = _pick_k_tile(Lk, k_block)
    act_dtype = tgt.dtype if compute_dtype is None else compute_dtype
    has_qpos = query_pos is not None
    has_pos = pos is not None

    # seq-first (L, N, E) -> batch-major (N, L, E).
    # TODO(synk): hoist these transposes (and the memory/pos casts) out of the per-layer
    # call when the same `memory` is reused across decoder layers / levels.
    tgt_b = jnp.transpose(tgt, (1, 0, 2))
    mem_b = jnp.transpose(memory, (1, 0, 2)).astype(act_dtype)
    qpos_b = None if not has_qpos else jnp.transpose(query_pos, (1, 0, 2))
    pos_b = None if not has_pos else jnp.transpose(pos, (1, 0, 2)).astype(act_dtype)

    wq, wk, wv, bq, bk, bv, wo, bo, gamma, beta = _prepare_attention_params(
        params, E, nhead, act_dtype)

    kernel = functools.partial(cross_attn_kernel, nhead=nhead, batch_block=bb,
                               has_qpos=has_qpos, has_pos=has_pos,
                               compute_dtype=act_dtype)

    inputs = [tgt_b]
    in_specs = [pl.BlockSpec((bb, Lq, E), lambda i, j: (i, 0, 0))]
    if has_qpos:
        inputs.append(qpos_b)
        in_specs.append(pl.BlockSpec((bb, Lq, E), lambda i, j: (i, 0, 0)))
    inputs.append(mem_b)
    in_specs.append(pl.BlockSpec((bb, tk, E), lambda i, j: (i, j, 0)))
    if has_pos:
        inputs.append(pos_b)
        in_specs.append(pl.BlockSpec((bb, tk, E), lambda i, j: (i, j, 0)))

    wspec = lambda shape: pl.BlockSpec(shape, lambda i, j: (0, 0))
    inputs += [wq, wk, wv, bq, bk, bv, wo, bo, gamma, beta]
    in_specs += ([wspec((E, E))] * 3 + [wspec((1, E))] * 3
                 + [wspec((E, E))] + [wspec((1, E))] * 3)

    scratch_shapes = [
        pltpu.VMEM((bb * nhead, Lq, hd), act_dtype),   # cached head-split Q
        pltpu.VMEM((bb * nhead, Lq, 1), jnp.float32),  # running max m
        pltpu.VMEM((bb * nhead, Lq, 1), jnp.float32),  # running denom l
        pltpu.VMEM((bb * nhead, Lq, hd), jnp.float32), # PV accumulator
    ]

    # Advisory cost estimate for XLA scheduling.
    nbytes = lambda x: int(x.size) * x.dtype.itemsize
    flops = 2 * B * (Lq + 2 * Lk) * E * E + 4 * B * Lq * Lk * E + 2 * B * Lq * E * E
    bytes_accessed = sum(nbytes(x) for x in inputs) + B * Lq * E * tgt.dtype.itemsize
    cost = pl.CostEstimate(flops=int(flops),
                           transcendentals=int(B * nhead * Lq * Lk),
                           bytes_accessed=int(bytes_accessed))

    cparams = dict(dimension_semantics=("parallel", "arbitrary"))
    if vmem_limit_bytes is not None:
        cparams['vmem_limit_bytes'] = vmem_limit_bytes

    out_b = pl.pallas_call(
        kernel,
        out_shape=jax.ShapeDtypeStruct((B, Lq, E), tgt.dtype),
        grid=(B // bb, Lk // tk),
        in_specs=in_specs,
        out_specs=pl.BlockSpec((bb, Lq, E), lambda i, j: (i, 0, 0)),
        scratch_shapes=scratch_shapes,
        compiler_params=pltpu.CompilerParams(**cparams),
        cost_estimate=cost,
    )(*inputs)

    return jnp.transpose(out_b, (1, 0, 2))                 # back to (Lq, B, E)


def reference_forward(tgt, memory, params, nhead, query_pos, pos):
    """Pure-JAX reference mirroring nn.MultiheadAttention + residual + LayerNorm."""
    Lq, B, E = tgt.shape
    hd = E // nhead
    q = tgt + query_pos
    k = memory + pos
    v = memory
    w_in = params['in_proj_weight']
    b_in = params['in_proj_bias']
    Q = q @ w_in[:E].T + b_in[:E]
    K = k @ w_in[E:2 * E].T + b_in[E:2 * E]
    V = v @ w_in[2 * E:].T + b_in[2 * E:]

    def split(x):
        L = x.shape[0]
        return jnp.transpose(x.reshape(L, B, nhead, hd), (1, 2, 0, 3))  # (B,h,L,hd)

    Qh, Kh, Vh = split(Q), split(K), split(V)
    s = jnp.einsum('bhqd,bhkd->bhqk', Qh, Kh) / jnp.sqrt(hd)
    p = jax.nn.softmax(s, axis=-1)
    o = jnp.einsum('bhqk,bhkd->bhqd', p, Vh)
    o = jnp.transpose(o, (2, 0, 1, 3)).reshape(Lq, B, E)
    o = o @ params['out_proj_weight'].T + params['out_proj_bias']
    x = tgt + o
    mu = x.mean(-1, keepdims=True)
    var = ((x - mu) ** 2).mean(-1, keepdims=True)
    y = (x - mu) / jnp.sqrt(var + 1e-5)
    return y * params['norm_weight'] + params['norm_bias']


def xavier_uniform(key, shape, dtype=jnp.float32):
    fan_out, fan_in = shape
    limit = float(np.sqrt(6.0 / (fan_in + fan_out)))
    return jax.random.uniform(key, shape, dtype, minval=-limit, maxval=limit)


if __name__ == "__main__":
    d_model = 32
    nhead = 4
    Lq = 8        # number of object queries (tgt length)
    Lk = 16       # memory (flattened feature map) length
    B = 2         # batch

    key = jax.random.PRNGKey(0)
    keys = jax.random.split(key, 10)

    params = {
        'in_proj_weight': xavier_uniform(keys[0], (3 * d_model, d_model)),
        'in_proj_bias': 0.01 * jax.random.normal(keys[1], (3 * d_model,), jnp.float32),
        'out_proj_weight': xavier_uniform(keys[2], (d_model, d_model)),
        'out_proj_bias': 0.01 * jax.random.normal(keys[3], (d_model,), jnp.float32),
        'norm_weight': jnp.ones((d_model,), jnp.float32),
        'norm_bias': jnp.zeros((d_model,), jnp.float32),
    }

    tgt = jax.random.normal(keys[4], (Lq, B, d_model), jnp.float32)
    memory = jax.random.normal(keys[5], (Lk, B, d_model), jnp.float32)
    query_pos = jax.random.normal(keys[6], (Lq, B, d_model), jnp.float32)
    pos = jax.random.normal(keys[7], (Lk, B, d_model), jnp.float32)

    ref = reference_forward(tgt, memory, params, nhead, query_pos, pos)

    # 1) f32, batch axis parallel over grid (v7x-style), Lk tiled into 2 online-softmax steps.
    out = cross_attention_layer(tgt, memory, params, nhead=nhead,
                                query_pos=query_pos, pos=pos,
                                batch_block=1, k_block=8)
    out = jax.block_until_ready(out)
    # Tolerance covers the EUP approximate-reciprocal softmax normalization (~1e-4 rel).
    np.testing.assert_allclose(np.asarray(out), np.asarray(ref), rtol=2e-3, atol=2e-3)

    # 2) bf16 MXU operands, whole batch fused into one grid step (single-TC v5e/v6e style).
    out_bf16 = cross_attention_layer(tgt, memory, params, nhead=nhead,
                                     query_pos=query_pos, pos=pos,
                                     batch_block=B, k_block=16,
                                     compute_dtype=jnp.bfloat16)
    out_bf16 = jax.block_until_ready(out_bf16)
    np.testing.assert_allclose(np.asarray(out_bf16), np.asarray(ref), rtol=0.1, atol=0.1)

    # 3) no positional embeddings: memory is DMA'd once and reused for K and V in-kernel.
    out_nopos = cross_attention_layer(tgt, memory, params, nhead=nhead,
                                      batch_block=1, k_block=8)
    out_nopos = jax.block_until_ready(out_nopos)
    ref_nopos = reference_forward(tgt, memory, params, nhead,
                                  jnp.zeros_like(query_pos), jnp.zeros_like(pos))
    np.testing.assert_allclose(np.asarray(out_nopos), np.asarray(ref_nopos),
                               rtol=2e-3, atol=2e-3)

    print("KERNEL_OK")
</pallas_src>

<mosaic_0001>
module attributes {stable_mosaic.version = 11 : i64} {
  func.func @cross_attn_kernel(%arg0: i32, %arg1: i32, %arg2: memref<1x8x32xf32, #tpu.memory_space<vmem>>, %arg3: memref<1x8x32xf32, #tpu.memory_space<vmem>>, %arg4: memref<1x8x32xf32, #tpu.memory_space<vmem>>, %arg5: memref<1x8x32xf32, #tpu.memory_space<vmem>>, %arg6: memref<32x32xf32, #tpu.memory_space<vmem>>, %arg7: memref<32x32xf32, #tpu.memory_space<vmem>>, %arg8: memref<32x32xf32, #tpu.memory_space<vmem>>, %arg9: memref<1x32xf32, #tpu.memory_space<vmem>>, %arg10: memref<1x32xf32, #tpu.memory_space<vmem>>, %arg11: memref<1x32xf32, #tpu.memory_space<vmem>>, %arg12: memref<32x32xf32, #tpu.memory_space<vmem>>, %arg13: memref<1x32xf32, #tpu.memory_space<vmem>>, %arg14: memref<1x32xf32, #tpu.memory_space<vmem>>, %arg15: memref<1x32xf32, #tpu.memory_space<vmem>>, %arg16: memref<1x8x32xf32, #tpu.memory_space<vmem>>, %arg17: memref<4x8x8xf32, #tpu.memory_space<vmem>>, %arg18: memref<4x8x1xf32, #tpu.memory_space<vmem>>, %arg19: memref<4x8x1xf32, #tpu.memory_space<vmem>>, %arg20: memref<4x8x8xf32, #tpu.memory_space<vmem>>) attributes {dimension_semantics = [#tpu.dimension_semantics<parallel>, #tpu.dimension_semantics<arbitrary>], iteration_bounds = array<i64: 2, 2>, scalar_prefetch = 0 : i64, scratch_operands = 4 : i64, tpu.core_type = #tpu.core_type<tc>, window_params = [{transform_indices = @transform_0, window_bounds = array<i64: 1, 8, 32>}, {transform_indices = @transform_1, window_bounds = array<i64: 1, 8, 32>}, {transform_indices = @transform_2, window_bounds = array<i64: 1, 8, 32>}, {transform_indices = @transform_3, window_bounds = array<i64: 1, 8, 32>}, {pipeline_mode = #tpu.pipeline_mode<synchronous>, transform_indices = @transform_4, window_bounds = array<i64: 32, 32>}, {pipeline_mode = #tpu.pipeline_mode<synchronous>, transform_indices = @transform_5, window_bounds = array<i64: 32, 32>}, {pipeline_mode = #tpu.pipeline_mode<synchronous>, transform_indices = @transform_6, window_bounds = array<i64: 32, 32>}, {pipeline_mode = #tpu.pipeline_mode<synchronous>, transform_indices = @transform_7, window_bounds = array<i64: 1, 32>}, {pipeline_mode = #tpu.pipeline_mode<synchronous>, transform_indices = @transform_8, window_bounds = array<i64: 1, 32>}, {pipeline_mode = #tpu.pipeline_mode<synchronous>, transform_indices = @transform_9, window_bounds = array<i64: 1, 32>}, {pipeline_mode = #tpu.pipeline_mode<synchronous>, transform_indices = @transform_10, window_bounds = array<i64: 32, 32>}, {pipeline_mode = #tpu.pipeline_mode<synchronous>, transform_indices = @transform_11, window_bounds = array<i64: 1, 32>}, {pipeline_mode = #tpu.pipeline_mode<synchronous>, transform_indices = @transform_12, window_bounds = array<i64: 1, 32>}, {pipeline_mode = #tpu.pipeline_mode<synchronous>, transform_indices = @transform_13, window_bounds = array<i64: 1, 32>}, {transform_indices = @transform_14, window_bounds = array<i64: 1, 8, 32>}]} {
    %c0_i32 = arith.constant 0 : i32
    %0 = arith.cmpi eq, %arg1, %c0_i32 : i32
    %1 = arith.extui %0 : i1 to i32
    %c0_i32_0 = arith.constant 0 : i32
    %2 = arith.cmpi ne, %1, %c0_i32_0 : i32
    scf.if %2 {
      %c0_41 = arith.constant 0 : index
      %c0_42 = arith.constant 0 : index
      %c0_43 = arith.constant 0 : index
      %67 = vector.load %arg2[%c0_41, %c0_42, %c0_43] : memref<1x8x32xf32, #tpu.memory_space<vmem>>, vector<1x8x32xf32>
      %c0_44 = arith.constant 0 : index
      %c0_45 = arith.constant 0 : index
      %c0_46 = arith.constant 0 : index
      %68 = vector.load %arg3[%c0_44, %c0_45, %c0_46] : memref<1x8x32xf32, #tpu.memory_space<vmem>>, vector<1x8x32xf32>
      %69 = arith.addf %67, %68 : vector<1x8x32xf32>
      %70 = vector.shape_cast %69 : vector<1x8x32xf32> to vector<8x32xf32>
      %c0_47 = arith.constant 0 : index
      %c0_48 = arith.constant 0 : index
      %71 = vector.load %arg6[%c0_47, %c0_48] : memref<32x32xf32, #tpu.memory_space<vmem>>, vector<32x32xf32>
      %cst_49 = arith.constant dense<0.000000e+00> : vector<8x32xf32>
      %72 = tpu.matmul %70, %71, %cst_49 {dimension_numbers = #tpu.dot_dimension_numbers<[1], [0], [0], [1], [0, 0, 1, 1], [], []>} : vector<8x32xf32>, vector<32x32xf32>, vector<8x32xf32> -> vector<8x32xf32>
      %c0_50 = arith.constant 0 : index
      %c0_51 = arith.constant 0 : index
      %73 = vector.load %arg9[%c0_50, %c0_51] : memref<1x32xf32, #tpu.memory_space<vmem>>, vector<1x32xf32>
      %74 = vector.broadcast %73 : vector<1x32xf32> to vector<8x32xf32>
      %75 = arith.addf %72, %74 : vector<8x32xf32>
      %76 = vector.shape_cast %75 : vector<8x32xf32> to vector<1x8x32xf32>
      %77 = vector.extract_strided_slice %76 {offsets = [0, 0, 0], sizes = [1, 8, 8], strides = [1, 1, 1]} : vector<1x8x32xf32> to vector<1x8x8xf32>
      %78 = vector.extract_strided_slice %76 {offsets = [0, 0, 8], sizes = [1, 8, 8], strides = [1, 1, 1]} : vector<1x8x32xf32> to vector<1x8x8xf32>
      %79 = vector.extract_strided_slice %76 {offsets = [0, 0, 16], sizes = [1, 8, 8], strides = [1, 1, 1]} : vector<1x8x32xf32> to vector<1x8x8xf32>
      %80 = vector.extract_strided_slice %76 {offsets = [0, 0, 24], sizes = [1, 8, 8], strides = [1, 1, 1]} : vector<1x8x32xf32> to vector<1x8x8xf32>
      %81 = vector.shape_cast %77 : vector<1x8x8xf32> to vector<1x1x8x8xf32>
      %82 = vector.shape_cast %78 : vector<1x8x8xf32> to vector<1x1x8x8xf32>
      %83 = vector.shape_cast %79 : vector<1x8x8xf32> to vector<1x1x8x8xf32>
      %84 = vector.shape_cast %80 : vector<1x8x8xf32> to vector<1x1x8x8xf32>
      %85 = tpu.concatenate %81, %82, %83, %84 in 1 : vector<1x1x8x8xf32>, vector<1x1x8x8xf32>, vector<1x1x8x8xf32>, vector<1x1x8x8xf32> -> vector<1x4x8x8xf32>
      %86 = vector.shape_cast %85 : vector<1x4x8x8xf32> to vector<4x8x8xf32>
      %c0_52 = arith.constant 0 : index
      %c0_53 = arith.constant 0 : index
      %c0_54 = arith.constant 0 : index
      %87 = vector.load %arg17[%c0_52, %c0_53, %c0_54] : memref<4x8x8xf32, #tpu.memory_space<vmem>>, vector<4x8x8xf32>
      tpu.vector_store %arg17[%c0_52, %c0_53, %c0_54], %86 {strides = array<i32>} : memref<4x8x8xf32, #tpu.memory_space<vmem>>, vector<4x8x8xf32>,
      %cst_55 = arith.constant 0xFF800000 : f32
      %88 = vector.broadcast %cst_55 : f32 to vector<4x8x1xf32>
      %c0_56 = arith.constant 0 : index
      %c0_57 = arith.constant 0 : index
      %c0_58 = arith.constant 0 : index
      %89 = vector.load %arg18[%c0_56, %c0_57, %c0_58] : memref<4x8x1xf32, #tpu.memory_space<vmem>>, vector<4x8x1xf32>
      tpu.vector_store %arg18[%c0_56, %c0_57, %c0_58], %88 {strides = array<i32>} : memref<4x8x1xf32, #tpu.memory_space<vmem>>, vector<4x8x1xf32>,
      %cst_59 = arith.constant 0.000000e+00 : f32
      %90 = vector.broadcast %cst_59 : f32 to vector<4x8x1xf32>
      %c0_60 = arith.constant 0 : index
      %c0_61 = arith.constant 0 : index
      %c0_62 = arith.constant 0 : index
      %91 = vector.load %arg19[%c0_60, %c0_61, %c0_62] : memref<4x8x1xf32, #tpu.memory_space<vmem>>, vector<4x8x1xf32>
      tpu.vector_store %arg19[%c0_60, %c0_61, %c0_62], %90 {strides = array<i32>} : memref<4x8x1xf32, #tpu.memory_space<vmem>>, vector<4x8x1xf32>,
      %cst_63 = arith.constant 0.000000e+00 : f32
      %92 = vector.broadcast %cst_63 : f32 to vector<4x8x8xf32>
      %c0_64 = arith.constant 0 : index
      %c0_65 = arith.constant 0 : index
      %c0_66 = arith.constant 0 : index
      %93 = vector.load %arg20[%c0_64, %c0_65, %c0_66] : memref<4x8x8xf32, #tpu.memory_space<vmem>>, vector<4x8x8xf32>
      tpu.vector_store %arg20[%c0_64, %c0_65, %c0_66], %92 {strides = array<i32>} : memref<4x8x8xf32, #tpu.memory_space<vmem>>, vector<4x8x8xf32>,
    } else {
    }
    %c0 = arith.constant 0 : index
    %c0_1 = arith.constant 0 : index
    %c0_2 = arith.constant 0 : index
    %3 = vector.load %arg4[%c0, %c0_1, %c0_2] : memref<1x8x32xf32, #tpu.memory_space<vmem>>, vector<1x8x32xf32>
    %c0_3 = arith.constant 0 : index
    %c0_4 = arith.constant 0 : index
    %c0_5 = arith.constant 0 : index
    %4 = vector.load %arg5[%c0_3, %c0_4, %c0_5] : memref<1x8x32xf32, #tpu.memory_space<vmem>>, vector<1x8x32xf32>
    %5 = arith.addf %3, %4 : vector<1x8x32xf32>
    %6 = vector.shape_cast %5 : vector<1x8x32xf32> to vector<8x32xf32>
    %7 = vector.shape_cast %3 : vector<1x8x32xf32> to vector<8x32xf32>
    %c0_6 = arith.constant 0 : index
    %c0_7 = arith.constant 0 : index
    %8 = vector.load %arg7[%c0_6, %c0_7] : memref<32x32xf32, #tpu.memory_space<vmem>>, vector<32x32xf32>
    %cst = arith.constant dense<0.000000e+00> : vector<8x32xf32>
    %9 = tpu.matmul %6, %8, %cst {dimension_numbers = #tpu.dot_dimension_numbers<[1], [0], [0], [1], [0, 0, 1, 1], [], []>} : vector<8x32xf32>, vector<32x32xf32>, vector<8x32xf32> -> vector<8x32xf32>
    %c0_8 = arith.constant 0 : index
    %c0_9 = arith.constant 0 : index
    %10 = vector.load %arg10[%c0_8, %c0_9] : memref<1x32xf32, #tpu.memory_space<vmem>>, vector<1x32xf32>
    %11 = vector.broadcast %10 : vector<1x32xf32> to vector<8x32xf32>
    %12 = arith.addf %9, %11 : vector<8x32xf32>
    %c0_10 = arith.constant 0 : index
    %c0_11 = arith.constant 0 : index
    %13 = vector.load %arg8[%c0_10, %c0_11] : memref<32x32xf32, #tpu.memory_space<vmem>>, vector<32x32xf32>
    %cst_12 = arith.constant dense<0.000000e+00> : vector<8x32xf32>
    %14 = tpu.matmul %7, %13, %cst_12 {dimension_numbers = #tpu.dot_dimension_numbers<[1], [0], [0], [1], [0, 0, 1, 1], [], []>} : vector<8x32xf32>, vector<32x32xf32>, vector<8x32xf32> -> vector<8x32xf32>
    %c0_13 = arith.constant 0 : index
    %c0_14 = arith.constant 0 : index
    %15 = vector.load %arg11[%c0_13, %c0_14] : memref<1x32xf32, #tpu.memory_space<vmem>>, vector<1x32xf32>
    %16 = vector.broadcast %15 : vector<1x32xf32> to vector<8x32xf32>
    %17 = arith.addf %14, %16 : vector<8x32xf32>
    %18 = vector.shape_cast %12 : vector<8x32xf32> to vector<1x8x32xf32>
    %19 = vector.extract_strided_slice %18 {offsets = [0, 0, 0], sizes = [1, 8, 8], strides = [1, 1, 1]} : vector<1x8x32xf32> to vector<1x8x8xf32>
    %20 = vector.extract_strided_slice %18 {offsets = [0, 0, 8], sizes = [1, 8, 8], strides = [1, 1, 1]} : vector<1x8x32xf32> to vector<1x8x8xf32>
    %21 = vector.extract_strided_slice %18 {offsets = [0, 0, 16], sizes = [1, 8, 8], strides = [1, 1, 1]} : vector<1x8x32xf32> to vector<1x8x8xf32>
    %22 = vector.extract_strided_slice %18 {offsets = [0, 0, 24], sizes = [1, 8, 8], strides = [1, 1, 1]} : vector<1x8x32xf32> to vector<1x8x8xf32>
    %23 = vector.shape_cast %19 : vector<1x8x8xf32> to vector<1x1x8x8xf32>
    %24 = vector.shape_cast %20 : vector<1x8x8xf32> to vector<1x1x8x8xf32>
    %25 = vector.shape_cast %21 : vector<1x8x8xf32> to vector<1x1x8x8xf32>
    %26 = vector.shape_cast %22 : vector<1x8x8xf32> to vector<1x1x8x8xf32>
    %27 = tpu.concatenate %23, %24, %25, %26 in 1 : vector<1x1x8x8xf32>, vector<1x1x8x8xf32>, vector<1x1x8x8xf32>, vector<1x1x8x8xf32> -> vector<1x4x8x8xf32>
    %28 = vector.shape_cast %27 : vector<1x4x8x8xf32> to vector<4x8x8xf32>
    %29 = vector.shape_cast %17 : vector<8x32xf32> to vector<1x8x32xf32>
    %30 = vector.extract_strided_slice %29 {offsets = [0, 0, 0], sizes = [1, 8, 8], strides = [1, 1, 1]} : vector<1x8x32xf32> to vector<1x8x8xf32>
    %31 = vector.extract_strided_slice %29 {offsets = [0, 0, 8], sizes = [1, 8, 8], strides = [1, 1, 1]} : vector<1x8x32xf32> to vector<1x8x8xf32>
    %32 = vector.extract_strided_slice %29 {offsets = [0, 0, 16], sizes = [1, 8, 8], strides = [1, 1, 1]} : vector<1x8x32xf32> to vector<1x8x8xf32>
    %33 = vector.extract_strided_slice %29 {offsets = [0, 0, 24], sizes = [1, 8, 8], strides = [1, 1, 1]} : vector<1x8x32xf32> to vector<1x8x8xf32>
    %34 = vector.shape_cast %30 : vector<1x8x8xf32> to vector<1x1x8x8xf32>
    %35 = vector.shape_cast %31 : vector<1x8x8xf32> to vector<1x1x8x8xf32>
    %36 = vector.shape_cast %32 : vector<1x8x8xf32> to vector<1x1x8x8xf32>
    %37 = vector.shape_cast %33 : vector<1x8x8xf32> to vector<1x1x8x8xf32>
    %38 = tpu.concatenate %34, %35, %36, %37 in 1 : vector<1x1x8x8xf32>, vector<1x1x8x8xf32>, vector<1x1x8x8xf32>, vector<1x1x8x8xf32> -> vector<1x4x8x8xf32>
    %39 = vector.shape_cast %38 : vector<1x4x8x8xf32> to vector<4x8x8xf32>
    %c0_15 = arith.constant 0 : index
    %c0_16 = arith.constant 0 : index
    %c0_17 = arith.constant 0 : index
    %40 = vector.load %arg17[%c0_15, %c0_16, %c0_17] : memref<4x8x8xf32, #tpu.memory_space<vmem>>, vector<4x8x8xf32>
    "tpu.trace_start"() <{level = 10 : i32, message = "bqd,bkd->bqk"}> : () -> ()
    %cst_18 = arith.constant dense<0.000000e+00> : vector<4x8x8xf32>
    %41 = tpu.matmul %40, %28, %cst_18 {dimension_numbers = #tpu.dot_dimension_numbers<[2], [2], [1], [1], [0, 0, 0, 1, 1, 1], [0], [0]>} : vector<4x8x8xf32>, vector<4x8x8xf32>, vector<4x8x8xf32> -> vector<4x8x8xf32>
    "tpu.trace_stop"() : () -> ()
    %c0_19 = arith.constant 0 : index
    %c0_20 = arith.constant 0 : index
    %c0_21 = arith.constant 0 : index
    %42 = vector.load %arg18[%c0_19, %c0_20, %c0_21] : memref<4x8x1xf32, #tpu.memory_space<vmem>>, vector<4x8x1xf32>
    %cst_22 = arith.constant dense<0xFF800000> : vector<4x8xf32>
    %43 = vector.multi_reduction <maximumf>, %41, %cst_22 [2] : vector<4x8x8xf32> to vector<4x8xf32>
    %44 = vector.shape_cast %43 : vector<4x8xf32> to vector<4x8x1xf32>
    %45 = arith.maximumf %42, %44 : vector<4x8x1xf32>
    %46 = arith.subf %42, %45 : vector<4x8x1xf32>
    %47 = math.exp %46 : vector<4x8x1xf32>
    %48 = vector.broadcast %45 : vector<4x8x1xf32> to vector<4x8x8xf32>
    %49 = arith.subf %41, %48 : vector<4x8x8xf32>
    %50 = math.exp %49 : vector<4x8x8xf32>
    %c0_23 = arith.constant 0 : index
    %c0_24 = arith.constant 0 : index
    %c0_25 = arith.constant 0 : index
    %51 = vector.load %arg19[%c0_23, %c0_24, %c0_25] : memref<4x8x1xf32, #tpu.memory_space<vmem>>, vector<4x8x1xf32>
    %52 = arith.mulf %47, %51 : vector<4x8x1xf32>
    %cst_26 = arith.constant dense<0.000000e+00> : vector<4x8xf32>
    %53 = vector.multi_reduction <add>, %50, %cst_26 [2] : vector<4x8x8xf32> to vector<4x8xf32>
    %54 = vector.shape_cast %53 : vector<4x8xf32> to vector<4x8x1xf32>
    %55 = arith.addf %52, %54 : vector<4x8x1xf32>
    %c0_27 = arith.constant 0 : index
    %c0_28 = arith.constant 0 : index
    %c0_29 = arith.constant 0 : index
    %56 = vector.load %arg19[%c0_27, %c0_28, %c0_29] : memref<4x8x1xf32, #tpu.memory_space<vmem>>, vector<4x8x1xf32>
    tpu.vector_store %arg19[%c0_27, %c0_28, %c0_29], %55 {strides = array<i32>} : memref<4x8x1xf32, #tpu.memory_space<vmem>>, vector<4x8x1xf32>,
    %c0_30 = arith.constant 0 : index
    %c0_31 = arith.constant 0 : index
    %c0_32 = arith.constant 0 : index
    %57 = vector.load %arg20[%c0_30, %c0_31, %c0_32] : memref<4x8x8xf32, #tpu.memory_space<vmem>>, vector<4x8x8xf32>
    %58 = vector.broadcast %47 : vector<4x8x1xf32> to vector<4x8x8xf32>
    %59 = arith.mulf %58, %57 : vector<4x8x8xf32>
    "tpu.trace_start"() <{level = 10 : i32, message = "bqk,bkd->bqd"}> : () -> ()
    %cst_33 = arith.constant dense<0.000000e+00> : vector<4x8x8xf32>
    %60 = tpu.matmul %50, %39, %cst_33 {dimension_numbers = #tpu.dot_dimension_numbers<[2], [1], [1], [2], [0, 0, 0, 1, 1, 2], [0], [0]>} : vector<4x8x8xf32>, vector<4x8x8xf32>, vector<4x8x8xf32> -> vector<4x8x8xf32>
    "tpu.trace_stop"() : () -> ()
    %61 = arith.addf %59, %60 : vector<4x8x8xf32>
    %c0_34 = arith.constant 0 : index
    %c0_35 = arith.constant 0 : index
    %c0_36 = arith.constant 0 : index
    %62 = vector.load %arg20[%c0_34, %c0_35, %c0_36] : memref<4x8x8xf32, #tpu.memory_space<vmem>>, vector<4x8x8xf32>
    tpu.vector_store %arg20[%c0_34, %c0_35, %c0_36], %61 {strides = array<i32>} : memref<4x8x8xf32, #tpu.memory_space<vmem>>, vector<4x8x8xf32>,
    %c0_37 = arith.constant 0 : index
    %c0_38 = arith.constant 0 : index
    %c0_39 = arith.constant 0 : index
    %63 = vector.load %arg18[%c0_37, %c0_38, %c0_39] : memref<4x8x1xf32, #tpu.memory_space<vmem>>, vector<4x8x1xf32>
    tpu.vector_store %arg18[%c0_37, %c0_38, %c0_39], %45 {strides = array<i32>} : memref<4x8x1xf32, #tpu.memory_space<vmem>>, vector<4x8x1xf32>,
    %c1_i32 = arith.constant 1 : i32
    %64 = arith.cmpi eq, %arg1, %c1_i32 : i32
    %65 = arith.extui %64 : i1 to i32
    %c0_i32_40 = arith.constant 0 : i32
    %66 = arith.cmpi ne, %65, %c0_i32_40 : i32
    scf.if %66 {
      %c0_41 = arith.constant 0 : index
      %c0_42 = arith.constant 0 : index
      %c0_43 = arith.constant 0 : index
      %67 = vector.load %arg20[%c0_41, %c0_42, %c0_43] : memref<4x8x8xf32, #tpu.memory_space<vmem>>, vector<4x8x8xf32>
      %c0_44 = arith.constant 0 : index
      %c0_45 = arith.constant 0 : index
      %c0_46 = arith.constant 0 : index
      %68 = vector.load %arg19[%c0_44, %c0_45, %c0_46] : memref<4x8x1xf32, #tpu.memory_space<vmem>>, vector<4x8x1xf32>
      %69 = tpu.reciprocal %68 {approx = true} : vector<4x8x1xf32> -> vector<4x8x1xf32>
      %70 = vector.broadcast %69 : vector<4x8x1xf32> to vector<4x8x8xf32>
      %71 = arith.mulf %67, %70 : vector<4x8x8xf32>
      %72 = vector.shape_cast %71 : vector<4x8x8xf32> to vector<1x4x8x8xf32>
      %73 = vector.extract_strided_slice %72 {offsets = [0, 0, 0, 0], sizes = [1, 1, 8, 8], strides = [1, 1, 1, 1]} : vector<1x4x8x8xf32> to vector<1x1x8x8xf32>
      %74 = vector.shape_cast %73 : vector<1x1x8x8xf32> to vector<1x8x8xf32>
      %75 = vector.extract_strided_slice %72 {offsets = [0, 1, 0, 0], sizes = [1, 1, 8, 8], strides = [1, 1, 1, 1]} : vector<1x4x8x8xf32> to vector<1x1x8x8xf32>
      %76 = vector.shape_cast %75 : vector<1x1x8x8xf32> to vector<1x8x8xf32>
      %77 = vector.extract_strided_slice %72 {offsets = [0, 2, 0, 0], sizes = [1, 1, 8, 8], strides = [1, 1, 1, 1]} : vector<1x4x8x8xf32> to vector<1x1x8x8xf32>
      %78 = vector.shape_cast %77 : vector<1x1x8x8xf32> to vector<1x8x8xf32>
      %79 = vector.extract_strided_slice %72 {offsets = [0, 3, 0, 0], sizes = [1, 1, 8, 8], strides = [1, 1, 1, 1]} : vector<1x4x8x8xf32> to vector<1x1x8x8xf32>
      %80 = vector.shape_cast %79 : vector<1x1x8x8xf32> to vector<1x8x8xf32>
      %81 = tpu.concatenate %74, %76, %78, %80 in 2 : vector<1x8x8xf32>, vector<1x8x8xf32>, vector<1x8x8xf32>, vector<1x8x8xf32> -> vector<1x8x32xf32>
      %82 = vector.shape_cast %81 : vector<1x8x32xf32> to vector<8x32xf32>
      %c0_47 = arith.constant 0 : index
      %c0_48 = arith.constant 0 : index
      %83 = vector.load %arg12[%c0_47, %c0_48] : memref<32x32xf32, #tpu.memory_space<vmem>>, vector<32x32xf32>
      %cst_49 = arith.constant dense<0.000000e+00> : vector<8x32xf32>
      %84 = tpu.matmul %82, %83, %cst_49 {dimension_numbers = #tpu.dot_dimension_numbers<[1], [0], [0], [1], [0, 0, 1, 1], [], []>} : vector<8x32xf32>, vector<32x32xf32>, vector<8x32xf32> -> vector<8x32xf32>
      %c0_50 = arith.constant 0 : index
      %c0_51 = arith.constant 0 : index
      %85 = vector.load %arg13[%c0_50, %c0_51] : memref<1x32xf32, #tpu.memory_space<vmem>>, vector<1x32xf32>
      %86 = vector.broadcast %85 : vector<1x32xf32> to vector<8x32xf32>
      %87 = arith.addf %84, %86 : vector<8x32xf32>
      %c0_52 = arith.constant 0 : index
      %c0_53 = arith.constant 0 : index
      %c0_54 = arith.constant 0 : index
      %88 = vector.load %arg2[%c0_52, %c0_53, %c0_54] : memref<1x8x32xf32, #tpu.memory_space<vmem>>, vector<1x8x32xf32>
      %89 = vector.shape_cast %88 : vector<1x8x32xf32> to vector<8x32xf32>
      %90 = arith.addf %89, %87 : vector<8x32xf32>
      %cst_55 = arith.constant dense<0.000000e+00> : vector<8xf32>
      %91 = vector.multi_reduction <add>, %90, %cst_55 [1] : vector<8x32xf32> to vector<8xf32>
      %92 = vector.shape_cast %91 : vector<8xf32> to vector<8x1xf32>
      %cst_56 = arith.constant 3.200000e+01 : f32
      %93 = vector.broadcast %cst_56 : f32 to vector<8x1xf32>
      %94 = arith.divf %92, %93 : vector<8x1xf32>
      %95 = vector.broadcast %94 : vector<8x1xf32> to vector<8x32xf32>
      %96 = arith.subf %90, %95 : vector<8x32xf32>
      %97 = arith.mulf %96, %96 : vector<8x32xf32>
      %cst_57 = arith.constant dense<0.000000e+00> : vector<8xf32>
      %98 = vector.multi_reduction <add>, %97, %cst_57 [1] : vector<8x32xf32> to vector<8xf32>
      %99 = vector.shape_cast %98 : vector<8xf32> to vector<8x1xf32>
      %cst_58 = arith.constant 3.200000e+01 : f32
      %100 = vector.broadcast %cst_58 : f32 to vector<8x1xf32>
      %101 = arith.divf %99, %100 : vector<8x1xf32>
      %cst_59 = arith.constant 9.99999974E-6 : f32
      %102 = vector.broadcast %cst_59 : f32 to vector<8x1xf32>
      %103 = arith.addf %101, %102 : vector<8x1xf32>
      %104 = math.rsqrt %103 : vector<8x1xf32>
      %105 = vector.broadcast %104 : vector<8x1xf32> to vector<8x32xf32>
      %106 = arith.mulf %96, %105 : vector<8x32xf32>
      %c0_60 = arith.constant 0 : index
      %c0_61 = arith.constant 0 : index
      %107 = vector.load %arg14[%c0_60, %c0_61] : memref<1x32xf32, #tpu.memory_space<vmem>>, vector<1x32xf32>
      %108 = vector.broadcast %107 : vector<1x32xf32> to vector<8x32xf32>
      %109 = arith.mulf %106, %108 : vector<8x32xf32>
      %c0_62 = arith.constant 0 : index
      %c0_63 = arith.constant 0 : index
      %110 = vector.load %arg15[%c0_62, %c0_63] : memref<1x32xf32, #tpu.memory_space<vmem>>, vector<1x32xf32>
      %111 = vector.broadcast %110 : vector<1x32xf32> to vector<8x32xf32>
      %112 = arith.addf %109, %111 : vector<8x32xf32>
      %113 = vector.shape_cast %112 : vector<8x32xf32> to vector<1x8x32xf32>
      %c0_64 = arith.constant 0 : index
      %c0_65 = arith.constant 0 : index
      %c0_66 = arith.constant 0 : index
      %114 = vector.load %arg16[%c0_64, %c0_65, %c0_66] : memref<1x8x32xf32, #tpu.memory_space<vmem>>, vector<1x8x32xf32>
      tpu.vector_store %arg16[%c0_64, %c0_65, %c0_66], %113 {strides = array<i32>} : memref<1x8x32xf32, #tpu.memory_space<vmem>>, vector<1x8x32xf32>,
    } else {
    }
    return
  }
  func.func @transform_0(%arg0: i32, %arg1: i32) -> (i32, i32, i32) {
    %c0_i32 = arith.constant 0 : i32
    %c0_i32_0 = arith.constant 0 : i32
    %c0_i32_1 = arith.constant 0 : i32
    return %arg0, %c0_i32, %c0_i32_0 : i32, i32, i32
  }
  func.func @transform_1(%arg0: i32, %arg1: i32) -> (i32, i32, i32) {
    %c0_i32 = arith.constant 0 : i32
    %c0_i32_0 = arith.constant 0 : i32
    %c0_i32_1 = arith.constant 0 : i32
    return %arg0, %c0_i32, %c0_i32_0 : i32, i32, i32
  }
  func.func @transform_2(%arg0: i32, %arg1: i32) -> (i32, i32, i32) {
    %c0_i32 = arith.constant 0 : i32
    %c0_i32_0 = arith.constant 0 : i32
    return %arg0, %arg1, %c0_i32 : i32, i32, i32
  }
  func.func @transform_3(%arg0: i32, %arg1: i32) -> (i32, i32, i32) {
    %c0_i32 = arith.constant 0 : i32
    %c0_i32_0 = arith.constant 0 : i32
    return %arg0, %arg1, %c0_i32 : i32, i32, i32
  }
  func.func @transform_4(%arg0: i32, %arg1: i32) -> (i32, i32) {
    %c0_i32 = arith.constant 0 : i32
    %c0_i32_0 = arith.constant 0 : i32
    %c0_i32_1 = arith.constant 0 : i32
    return %c0_i32, %c0_i32_0 : i32, i32
  }
  func.func @transform_5(%arg0: i32, %arg1: i32) -> (i32, i32) {
    %c0_i32 = arith.constant 0 : i32
    %c0_i32_0 = arith.constant 0 : i32
    %c0_i32_1 = arith.constant 0 : i32
    return %c0_i32, %c0_i32_0 : i32, i32
  }
  func.func @transform_6(%arg0: i32, %arg1: i32) -> (i32, i32) {
    %c0_i32 = arith.constant 0 : i32
    %c0_i32_0 = arith.constant 0 : i32
    %c0_i32_1 = arith.constant 0 : i32
    return %c0_i32, %c0_i32_0 : i32, i32
  }
  func.func @transform_7(%arg0: i32, %arg1: i32) -> (i32, i32) {
    %c0_i32 = arith.constant 0 : i32
    %c0_i32_0 = arith.constant 0 : i32
    %c0_i32_1 = arith.constant 0 : i32
    return %c0_i32, %c0_i32_0 : i32, i32
  }
  func.func @transform_8(%arg0: i32, %arg1: i32) -> (i32, i32) {
    %c0_i32 = arith.constant 0 : i32
    %c0_i32_0 = arith.constant 0 : i32
    %c0_i32_1 = arith.constant 0 : i32
    return %c0_i32, %c0_i32_0 : i32, i32
  }
  func.func @transform_9(%arg0: i32, %arg1: i32) -> (i32, i32) {
    %c0_i32 = arith.constant 0 : i32
    %c0_i32_0 = arith.constant 0 : i32
    %c0_i32_1 = arith.constant 0 : i32
    return %c0_i32, %c0_i32_0 : i32, i32
  }
  func.func @transform_10(%arg0: i32, %arg1: i32) -> (i32, i32) {
    %c0_i32 = arith.constant 0 : i32
    %c0_i32_0 = arith.constant 0 : i32
    %c0_i32_1 = arith.constant 0 : i32
    return %c0_i32, %c0_i32_0 : i32, i32
  }
  func.func @transform_11(%arg0: i32, %arg1: i32) -> (i32, i32) {
    %c0_i32 = arith.constant 0 : i32
    %c0_i32_0 = arith.constant 0 : i32
    %c0_i32_1 = arith.constant 0 : i32
    return %c0_i32, %c0_i32_0 : i32, i32
  }
  func.func @transform_12(%arg0: i32, %arg1: i32) -> (i32, i32) {
    %c0_i32 = arith.constant 0 : i32
    %c0_i32_0 = arith.constant 0 : i32
    %c0_i32_1 = arith.constant 0 : i32
    return %c0_i32, %c0_i32_0 : i32, i32
  }
  func.func @transform_13(%arg0: i32, %arg1: i32) -> (i32, i32) {
    %c0_i32 = arith.constant 0 : i32
    %c0_i32_0 = arith.constant 0 : i32
    %c0_i32_1 = arith.constant 0 : i32
    return %c0_i32, %c0_i32_0 : i32, i32
  }
  func.func @transform_14(%arg0: i32, %arg1: i32) -> (i32, i32, i32) {
    %c0_i32 = arith.constant 0 : i32
    %c0_i32_0 = arith.constant 0 : i32
    %c0_i32_1 = arith.constant 0 : i32
    return %arg0, %c0_i32, %c0_i32_0 : i32, i32, i32
  }
}

</mosaic_0001>

<bundles_post_ra>
// kernel: tpu_custom_call.1
= control target key start
LH: loop header
LB: loop body
LE: loop exit
PB: predicated region body
PF: predicated region fallthrough
CT: control target
= control target key end

     0   :  { %s3515_s0 = inlined_call_operand.hbm [shape: f32[2,8,32], index: 0, kind: input, shape index: {}]   ;;  %s3516_s1 = inlined_call_operand.hbm [shape: f32[2,8,32], index: 1, kind: input, shape index: {}]   ;;  %s3517_s2 = inlined_call_operand.hbm [shape: f32[2,16,32], index: 2, kind: input, shape index: {}]   ;;  %s3518_s3 = inlined_call_operand.hbm [shape: f32[2,16,32], index: 3, kind: input, shape index: {}]   ;;  %s3519_s4 = inlined_call_operand.hbm [shape: f32[32,32], index: 4, kind: input, shape index: {}]   ;;  %s3520_s5 = inlined_call_operand.hbm [shape: f32[32,32], index: 5, kind: input, shape index: {}]   ;;  %s3521_s6 = inlined_call_operand.hbm [shape: f32[32,32], index: 6, kind: input, shape index: {}]   ;;  %s3522_s7 = inlined_call_operand.vmem [shape: f32[1,32], index: 7, kind: input, shape index: {}]   ;;  %s3523_s8 = inlined_call_operand.vmem [shape: f32[1,32], index: 8, kind: input, shape index: {}]   ;;  %s3524_s9 = inlined_call_operand.vmem [shape: f32[1,32], index: 9, kind: input, shape index: {}]   ;;  %s3525_s10 = inlined_call_operand.vmem [shape: f32[32,32], index: 10, kind: input, shape index: {}]   ;;  %s3526_s11 = inlined_call_operand.vmem [shape: f32[1,32], index: 11, kind: input, shape index: {}]   ;;  %s3527_s12 = inlined_call_operand.vmem [shape: f32[1,32], index: 12, kind: input, shape index: {}]   ;;  %s3528_s13 = inlined_call_operand.vmem [shape: f32[1,32], index: 13, kind: input, shape index: {}]   ;;  %s3529_s14 = inlined_call_operand.hbm [shape: f32[2,8,32], index: 14, kind: output, shape index: {}]  }
   0x1   :  { %3552 = sst [smem:[#allocation34_spill]] %s3515_s0 }
   0x2   :  { %3553 = sst [smem:[#allocation35_spill]] %s3516_s1 }
   0x3   :  { %3554 = sst [smem:[#allocation36_spill]] %s3519_s4 }
   0x4   :  { %3555 = sst [smem:[#allocation37_spill]] %s3520_s5 }
   0x5   :  { %3556 = sst [smem:[#allocation38_spill]] %s3521_s6 }
   0x6   :  { %3557 = sst [smem:[#allocation39_spill]] %s3522_s7 }
   0x7   :  { %3558 = sst [smem:[#allocation40_spill]] %s3523_s8 }
   0x8   :  { %3559 = sst [smem:[#allocation41_spill]] %s3524_s9 }
   0x9   :  { %3560 = sst [smem:[#allocation42_spill]] %s3525_s10 }
   0xa   :  { %3561 = sst [smem:[#allocation43_spill]] %s3526_s11 }
   0xb   :  { %3562 = sst [smem:[#allocation44_spill]] %s3527_s12 }
   0xc   :  { %3563 = sst [smem:[#allocation45_spill]] %s3528_s13 }
   0xd   :  { %3564 = sst [smem:[#allocation46_spill]] %s3529_s14 }
   0xe   :  { %19 = vsyncpa [#allocation7], 0 }
   0xf   :  { %21 = vsyncpa [#allocation7 + $0x1], 0 }
  0x10   :  { %22 = vsyncpa [#allocation10], 0 }
  0x11   :  { %24 = vsyncpa [#allocation10 + $0x1], 0 }
  0x12   :  { %25 = vsyncpa [#allocation13], 0 }
  0x13   :  { %27 = vsyncpa [#allocation13 + $0x1], 0 }
  0x14   :  { %28 = vsyncpa [#allocation16], 0 }
  0x15   :  { %29 = vsyncpa [#allocation8], 0 }
  0x16   :  { %31 = vsyncpa [#allocation8 + $0x1], 0  ;;  %s2913_s29 = smov 0   ;;  %s2915_s30 = smov 0  }
  0x17   :  { %s2917_s15 = smov 0   ;;  %s2919_s16 = smov 0  }
  0x18   :  { %s2921_s17 = smov 0   ;;  %s2923_s18 = smov 0  }
  0x19   :  { %s2925_s19 = smov 0   ;;  %s2927_s20 = smov 0  }
  0x1a   :  { %s2929_s21 = smov 0   ;;  %s2931_s22 = smov 0  }
  0x1b   :  { %s2933_s23 = smov 0  }
  0x1c LB: > { %3565 = sst [smem:[#allocation26_spill]] %s2777_s16  ;;  %s2967_s24 = sadd.s32 4294967295, %s2805_s23   ;;  %s2805_s23 = sphi %s2933_s23, %s37_s23   ;;  %s2801_s22 = sphi %s2931_s22, %s3636_s22   ;;  %s2797_s21 = sphi %s2929_s21, %s3626_s21   ;;  %s2793_s20 = sphi %s2927_s20, %s3635_s20   ;;  %s2789_s19 = sphi %s2925_s19, %s3634_s19   ;;  %s2785_s18 = sphi %s2923_s18, %s3633_s18   ;;  %s2781_s17 = sphi %s2921_s17, %s3632_s17   ;;  %s2777_s16 = sphi %s2919_s16, %s3631_s16   ;;  %s2773_s15 = sphi %s2917_s15, %s3630_s15   ;;  %s2769_s30 = sphi %s2915_s30, %s3629_s30   ;;  %s2765_s29 = sphi %s2913_s29, %s3628_s29  }
  0x1d   : > { %3566 = sst [smem:[#allocation27_spill]] %s2789_s19  ;;  %p123_p0 = scmp.ne.s32.totalorder %s2769_s30, %s2765_s29 }
  0x1e   : > { %3567 = sst [smem:[#allocation28_spill]] %s2793_s20  ;;  %p3532_p1 = scmp.eq.s32.totalorder %s2967_s24, 0 }
  0x1f   : > { %3568 = sst [smem:[#allocation29_spill]] %s2797_s21  ;;  %p2062_p2 = scmp.ge.s32.totalorder %s2805_s23, 1 }
  0x20   : > { %p398_p3 = scmp.lt.s32.totalorder %s2805_s23, 5  ;;  %p2975_p4 = por %p123_p0, %p3532_p1 }
  0x21   : > { %s2807_s27 = smov [#allocation14]   ;;  %s2808_s14 = smov [#allocation15]  }
  0x22   : > { %s3569_s25 = scalar_select %p2975_p4, 1, 0 }
  0x23   : > { %p2979_p5 = pnand %p2062_p2, %p398_p3  ;;  %s410_s28 = sshll.u32 %s2807_s27, 4  ;;  %s411_s28 = int_to_ptr.vmem [resolvable:$true] %s410_s28 }
  0x24   : > { %3570 = sst [smem:[#allocation30_spill]] %s3569_s25  ;;  %s423_s20 = sshll.u32 %s2808_s14, 4  ;;  %s2991_s20 = int_to_ptr.vmem [resolvable:$true] %s423_s20 }
  0x25   : > { %s3571_s26 = scalar_select %p2979_p5, 1, 0 }
  0x26   : > { %p2280_p6 = pneg %p2979_p5  ;;  %s3574_s4 = sld [smem:[#allocation36_spill]] }
  0x27   : > { %3572 = sst [smem:[#allocation31_spill]] %s3571_s26 }
  0x28   : > { %p2987_p7 = pnand %p2280_p6, %p3532_p1 }
  0x2a   : > { %s3573_s29 = scalar_select %p2987_p7, 1, 0 }
  0x2b   : > { %p3001_p9 = pneg %p2987_p7 }
  0x2c   : > { %s2459_s11 = scalar_lea.hbm %s3574_s4, 512 }
  0x2d   : > { %p2460_p8 = scmp.ne.s32.totalorder %s3574_s4, %s2459_s11  ;;  %p2466_p12 = scmp.lt.u32.totalorder %s2459_s11, %s3574_s4 }
  0x2f   : > { %p2462_p10 = pnand %p3001_p9, %p2460_p8 }
  0x31   : > { %p2463_p11 = pneg %p2462_p10 }
  0x33   : > { %p2468_p13 = pnand %p2466_p12, %p2463_p11 }
  0x35   : > { %2471 = shalt.err (!%p2468_p13)
}
  0x36   : > { %s2472_s12 = scalar_lea.vmem %s411_s28, 512  ;;  %p2480_p6 = scmp.lt.s32.totalorder %s411_s28, %s411_s28 }
  0x37   : > { %p2473_p0 = scmp.ne.s32.totalorder %s411_s28, %s2472_s12  ;;  %p2481_p1 = scmp.lt.s32.totalorder %s2472_s12, %s2472_s12 }
  0x39   : > { %p2475_p2 = pnand %p2473_p0, %p3001_p9  ;;  %p2482_p4 = por %p2481_p1, %p2480_p6 }
  0x3b   : > { %p2476_p3 = pneg %p2475_p2 }
  0x3d   : > { %p2483_p5 = pnand %p2482_p4, %p2476_p3 }
  0x3f   : > { %2486 = shalt.err (!%p2483_p5)
}
  0x40   : > { %s3539_s9 = smov 128   ;;  %s3541_s10 = smov 8  }
  0x41   : > { %2283 = dma.hbm_to_vmem [thread:$0]  (!%p2987_p7), %s3574_s4, 512, %s411_s28, [#allocation13], %s3539_s9, %s3539_s9, %s3541_s10  }
  0x42   : > { %s3576_s5 = sld [smem:[#allocation37_spill]] }
  0x48   : > { %s2487_s7 = scalar_lea.hbm %s3576_s5, 512 }
  0x49   : > { %p2488_p1 = scmp.ne.s32.totalorder %s3576_s5, %s2487_s7  ;;  %p2494_p8 = scmp.lt.u32.totalorder %s2487_s7, %s3576_s5 }
  0x4b   : > { %p2490_p4 = pnand %p2488_p1, %p3001_p9 }
  0x4d   : > { %p2491_p5 = pneg %p2490_p4 }
  0x4f   : > { %p2496_p10 = pnand %p2494_p8, %p2491_p5 }
  0x51   : > { %2499 = shalt.err (!%p2496_p10)
}
  0x52   : > { %s2500_s28 = scalar_lea.vmem %s2991_s20, 512  ;;  %p2508_p0 = scmp.lt.s32.totalorder %s2991_s20, %s2991_s20 }
  0x53   : > { %p2501_p11 = scmp.ne.s32.totalorder %s2991_s20, %s2500_s28  ;;  %p2509_p2 = scmp.lt.s32.totalorder %s2500_s28, %s2500_s28 }
  0x55   : > { %p2503_p12 = pnand %p2501_p11, %p3001_p9  ;;  %p2510_p3 = por %p2509_p2, %p2508_p0 }
  0x57   : > { %p2504_p13 = pneg %p2503_p12 }
  0x59   : > { %p2511_p6 = pnand %p2510_p3, %p2504_p13 }
  0x5b   : > { %2514 = shalt.err (!%p2511_p6)
}
  0x5c   : > { %2286 = dma.hbm_to_vmem [thread:$0]  (!%p2987_p7), %s3576_s5, 512, %s2991_s20, [#allocation16], %s3539_s9, %s3539_s9, %s3541_s10  }
  0x5d   : > { %s2061_s25 = sadd.s32 4294967294, %s2805_s23   ;;  %p63_p1 = scmp.ne.s32.totalorder %s2785_s18, %s2781_s17 }
  0x5e   : > { %p64_p4 = scmp.eq.s32.totalorder %s2805_s23, 0  ;;  %p69_p5 = scmp.ne.s32.totalorder %s2781_s17, %s2777_s16 }
  0x5f   : > { %p117_p8 = scmp.ne.s32.totalorder %s2773_s15, %s2769_s30  ;;  %p385_p10 = scmp.eq.s32.totalorder %s2967_s24, 3 }
  0x60   : > { %p65_p11 = por %p64_p4, %p63_p1  ;;  %p3577_p12 = scmp.eq.s32.totalorder %s2967_s24, 0 }
  0x61   : > { %p3063_p0 = por %p117_p8, %p64_p4  ;;  %p3067_p2 = por %p385_p10, %p63_p1 }
  0x62   : > { %p3059_p13 = por %p3577_p12, %p69_p5  ;;  %p391_p3 = scmp.eq.s32.totalorder %s2061_s25, 3 }
  0x63   : > { %s3580_s13 = scalar_select %p3067_p2, 1, 0 }
  0x64   : > { %s3578_s11 = scalar_select %p3059_p13, 1, 0 }
  0x65   : > { %p2310_p6 = scmp.lt.s32.totalorder %s2805_s23, 4  ;;  %s3540_s14 = sand.u32 1, %s2785_s18  }
  0x66   : > { %s3543_s12 = sshll.u32 %s2801_s22, 7  ;;  %p3074_p7 = por %p391_p3, %p69_p5 }
  0x67   : > { %s3080_s7 = sshll.u32 %s3540_s14, 3  ;;  %p3082_p4 = pnand %p2310_p6, %p65_p11 }
  0x68   : > { %s3581_s28 = scalar_select %p3074_p7, 1, 0 }
  0x69   : > { %s3545_s8 = sand.u32 1, %s2805_s23   ;;  %s3584_s1 = sld [smem:[#allocation35_spill]] }
  0x6a   : > { %3582 = sst [smem:[#allocation32_spill]] %s3581_s28  ;;  %s493_s14 = scalar_lea.vmem [#allocation9], %s3080_s7 }
  0x6b   : > { %s500_s10 = sshll.u32 %s493_s14, 4  ;;  %p3097_p1 = pnand %p2310_p6, %p3063_p0  ;;  %s3101_s10 = int_to_ptr.vmem [resolvable:$true] %s500_s10 }
  0x6c   : > { %s3105_s5 = scalar_lea.sflag [#allocation10], %s3545_s8  ;;  %p3549_p8 = pneg %p3082_p4 }
  0x6d   : > { %s3585_s4 = scalar_select %p3097_p1, 1, 0 }
  0x6f   : > { %s3092_s9 = scalar_lea.hbm %s3584_s1, %s3543_s12  ;;  %s2520_s20 = scalar_lea.hbm %s3584_s1, 256 }
  0x70   : > { %s2515_s28 = scalar_lea.hbm %s3092_s9, 128  ;;  %p2521_p12 = scmp.lt.u32.totalorder %s3092_s9, %s3584_s1 }
  0x71   : > { %p2516_p5 = scmp.ne.s32.totalorder %s3092_s9, %s2515_s28  ;;  %p2522_p0 = scmp.lt.u32.totalorder %s2520_s20, %s2515_s28 }
  0x72   : > { %p2524_p6 = scmp.lt.u32.totalorder %s2515_s28, %s3092_s9 }
  0x73   : > { %p2518_p10 = pnand %p3549_p8, %p2516_p5  ;;  %p2523_p3 = por %p2522_p0, %p2521_p12 }
  0x75   : > { %p2519_p11 = pneg %p2518_p10  ;;  %p2525_p7 = por %p2524_p6, %p2523_p3 }
  0x77   : > { %p2526_p2 = pnand %p2525_p7, %p2519_p11 }
  0x79   : > { %2529 = shalt.err (!%p2526_p2)
}
  0x7a   : > { %s2530_s8 = scalar_lea.vmem %s3101_s10, 128  ;;  %s2811_s26 = smov [#allocation9]  }
  0x7b   : > { %p2531_p5 = scmp.ne.s32.totalorder %s3101_s10, %s2530_s8  ;;  %s2535_s14 = sshll.u32 %s2811_s26, 4  ;;  %s2536_s14 = int_to_ptr.vmem [resolvable:$false] %s2535_s14 }
  0x7c   : > { %s2537_s12 = scalar_lea.vmem %s2536_s14, 256  ;;  %p2538_p1 = scmp.lt.s32.totalorder %s3101_s10, %s2536_s14 }
  0x7d   : > { %p2533_p10 = pnand %p2531_p5, %p3549_p8  ;;  %p2539_p12 = scmp.lt.s32.totalorder %s2537_s12, %s2530_s8 }
  0x7f   : > { %p2534_p13 = pneg %p2533_p10  ;;  %p2540_p0 = por %p2539_p12, %p2538_p1 }
  0x81   : > { %p2541_p3 = pnand %p2540_p0, %p2534_p13 }
  0x83   : > { %2544 = shalt.err (!%p2541_p3)
}
  0x84   : > { %2296 = dma.hbm_to_vmem [thread:$0]  (!%p3082_p4), %s3092_s9, 128, %s3101_s10, %s3105_s5  }
  0x85   : > { %s2812_s28 = smov [#allocation17]   ;;  %s3586_s6 = sld [smem:[#allocation38_spill]] }
  0x86   : > { %s436_s20 = sshll.u32 %s2812_s28, 4  ;;  %s437_s20 = int_to_ptr.vmem [resolvable:$true] %s436_s20 }
  0x8b   : > { %s2545_s26 = scalar_lea.hbm %s3586_s6, 512 }
  0x8c   : > { %p2546_p7 = scmp.ne.s32.totalorder %s3586_s6, %s2545_s26  ;;  %p2552_p1 = scmp.lt.u32.totalorder %s2545_s26, %s3586_s6 }
  0x8e   : > { %p2548_p13 = pnand %p2546_p7, %p3001_p9 }
  0x90   : > { %p2549_p2 = pneg %p2548_p13 }
  0x92   : > { %p2554_p11 = pnand %p2552_p1, %p2549_p2 }
  0x94   : > { %2557 = shalt.err (!%p2554_p11)
}
  0x95   : > { %s2558_s9 = scalar_lea.vmem %s437_s20, 512  ;;  %p2566_p12 = scmp.lt.s32.totalorder %s437_s20, %s437_s20 }
  0x96   : > { %p2559_p6 = scmp.ne.s32.totalorder %s437_s20, %s2558_s9  ;;  %p2567_p0 = scmp.lt.s32.totalorder %s2558_s9, %s2558_s9 }
  0x98   : > { %p2561_p5 = pnand %p2559_p6, %p3001_p9  ;;  %p2568_p3 = por %p2567_p0, %p2566_p12 }
  0x9a   : > { %p2562_p10 = pneg %p2561_p5 }
  0x9c   : > { %p2569_p8 = pnand %p2568_p3, %p2562_p10 }
  0x9e   : > { %2572 = shalt.err (!%p2569_p8)
}
  0x9f   : > { %p3587_p7 = scmp.ne.s32.totalorder %s3573_s29, 0  ;;  %s3588_s1 = smov 8  }
  0xa0   : > { %s3589_s16 = smov 128   ;;  %s3590_s27 = sshll.u32 %s2801_s22, 7 }
  0xa1   : > { %2289 = dma.hbm_to_vmem [thread:$0]  (!%p3587_p7), %s3586_s6, 512, %s437_s20, [#allocation16], %s3589_s16, %s3589_s16, %s3588_s1  }
  0xa2   : > { %s3591_s0 = sld [smem:[#allocation34_spill]]  ;;  %s475_s29 = scalar_lea.vmem [#allocation6], %s3080_s7 }
  0xa3   : > { %s482_s8 = sshll.u32 %s475_s29, 4  ;;  %s3592_s12 = sand.u32 1, %s2785_s18   ;;  %s483_s8 = int_to_ptr.vmem [resolvable:$true] %s482_s8 }
  0xa4   : > { %s472_s9 = scalar_lea.sflag [#allocation7], %s3592_s12  ;;  %p3593_p8 = pneg %p3082_p4 }
  0xa8   : > { %s3159_s14 = scalar_lea.hbm %s3591_s0, %s3590_s27  ;;  %s2578_s16 = scalar_lea.hbm %s3591_s0, 256 }
  0xa9   : > { %s2573_s10 = scalar_lea.hbm %s3159_s14, 128  ;;  %p2579_p1 = scmp.lt.u32.totalorder %s3159_s14, %s3591_s0 }
  0xaa   : > { %p2574_p9 = scmp.ne.s32.totalorder %s3159_s14, %s2573_s10  ;;  %p2580_p11 = scmp.lt.u32.totalorder %s2578_s16, %s2573_s10 }
  0xab   : > { %p2582_p5 = scmp.lt.u32.totalorder %s2573_s10, %s3159_s14 }
  0xac   : > { %p2576_p13 = pnand %p2574_p9, %p3593_p8  ;;  %p2581_p6 = por %p2580_p11, %p2579_p1 }
  0xae   : > { %p2577_p2 = pneg %p2576_p13  ;;  %p2583_p10 = por %p2582_p5, %p2581_p6 }
  0xb0   : > { %p2584_p12 = pnand %p2583_p10, %p2577_p2 }
  0xb2   : > { %2587 = shalt.err (!%p2584_p12)
}
  0xb3   : > { %s2588_s7 = scalar_lea.vmem %s483_s8, 128  ;;  %p3594_p3 = pmov %p3593_p8 }
  0xb4   : > { %p2589_p0 = scmp.ne.s32.totalorder %s483_s8, %s2588_s7  ;;  %s2813_s25 = smov [#allocation6]  }
  0xb5   : > { %s2593_s26 = sshll.u32 %s2813_s25, 4  ;;  %s2594_s26 = int_to_ptr.vmem [resolvable:$false] %s2593_s26 }
  0xb6   : > { %p2591_p7 = pnand %p2589_p0, %p3594_p3  ;;  %s2595_s29 = scalar_lea.vmem %s2594_s26, 256 }
  0xb7   : > { %p2596_p8 = scmp.lt.s32.totalorder %s483_s8, %s2594_s26  ;;  %p2597_p13 = scmp.lt.s32.totalorder %s2595_s29, %s2588_s7 }
  0xb8   : > { %p2592_p9 = pneg %p2591_p7 }
  0xb9   : > { %p2598_p1 = por %p2597_p13, %p2596_p8 }
  0xbb   : > { %p2599_p11 = pnand %p2598_p1, %p2592_p9 }
  0xbd   : > { %2602 = shalt.err (!%p2599_p11)
}
  0xbe   : > { %2293 = dma.hbm_to_vmem [thread:$0]  (!%p3082_p4), %s3159_s14, 128, %s483_s8, %s472_s9  }
  0xbf   : > { %s110_s12 = sadd.s32 1, %s2773_s15  ;;  %s46_s10 = sadd.s32 1, %s2797_s21 }
  0xc0   : > { %s509_s20 = sand.u32 1, %s2773_s15   ;;  %p47_p2 = scmp.ge.s32.totalorder %s46_s10, 2 }
  0xc1   : > { %s2071_s1 = sshll.u32 %s509_s20, 3  ;;  %s2072_s16 = sshll.u32 %s2801_s22, 1 }
  0xc2   : > { %s3638_s10 = smov (%p47_p2, %s46_s10), 0  ;;  %s3596_s19 = sadd.s32 1, %s2801_s22 }
  0xc3   : > { %3595 = sst [smem:[#allocation33_spill]] %s3638_s10  ;;  %s3640_s19 = smov (!%p47_p2, %s3596_s19), %s2801_s22 }
  0xc4   : > { %s106_s28 = ssub.s32 %s2797_s21, %s3638_s10  ;;  %s516_s27 = sadd.s32 %s2797_s21, %s2072_s16 }
  0xc5   : > { %p51_p6 = scmp.ge.s32.totalorder %s3640_s19, 2  ;;  %s2073_s7 = sshll.u32 %s516_s27, 7 }
  0xc6   : > { %s3198_s9 = scalar_lea.hbm %s3517_s2, %s2073_s7  ;;  %s511_s25 = scalar_lea.vmem [#allocation11], %s2071_s1 }
  0xc7   : > { %s520_s26 = sshll.u32 %s511_s25, 4  ;;  %s3642_s19 = smov (%p51_p6, %s3640_s19), 0  ;;  %s3202_s26 = int_to_ptr.vmem [resolvable:$true] %s520_s26 }
  0xc8   : > { %s53_s29 = ssub.s32 %s2801_s22, %s3642_s19  ;;  %s3209_s27 = scalar_lea.hbm %s3518_s3, %s2073_s7 }
  0xc9   : > { %p54_p4 = scmp.eq.s32.totalorder %s53_s29, 0  ;;  %s107_s14 = sor.u32 %s106_s28, %s53_s29 }
  0xca   : > { %p108_p5 = scmp.eq.s32.totalorder %s107_s14, 0  ;;  %s531_s8 = scalar_lea.vmem [#allocation12], %s2071_s1 }
  0xcb   : > { %s3211_s0 = sshll.u32 %s531_s8, 4  ;;  %s3597_s25 = sadd.s32 1, %s2785_s18  ;;  %s541_s0 = int_to_ptr.vmem [resolvable:$true] %s3211_s0 }
  0xcc   : > { %s3216_s6 = scalar_select %p54_p4, %s2785_s18, %s3597_s25  }
  0xcd   : > { %s3219_s10 = scalar_select %p108_p5, %s2773_s15, %s110_s12  }
  0xce   : > { %s2603_s21 = scalar_lea.hbm %s3198_s9, 128  ;;  %p3598_p12 = scmp.ne.s32.totalorder %s3585_s4, 0 }
  0xcf   : > { %p2604_p10 = scmp.ne.s32.totalorder %s3198_s9, %s2603_s21  ;;  %s2608_s28 = scalar_lea.hbm %s3517_s2, 512 }
  0xd0   : > { %p2605_p0 = pneg %p3598_p12  ;;  %p2609_p9 = scmp.lt.u32.totalorder %s3198_s9, %s3517_s2 }
  0xd1   : > { %p2610_p8 = scmp.lt.u32.totalorder %s2608_s28, %s2603_s21  ;;  %p2612_p1 = scmp.lt.u32.totalorder %s2603_s21, %s3198_s9 }
  0xd2   : > { %p2606_p3 = pnand %p2605_p0, %p2604_p10 }
  0xd3   : > { %p2611_p13 = por %p2610_p8, %p2609_p9 }
  0xd4   : > { %p2607_p7 = pneg %p2606_p3 }
  0xd5   : > { %p2613_p11 = por %p2612_p1, %p2611_p13 }
  0xd7   : > { %p2614_p2 = pnand %p2613_p11, %p2607_p7 }
  0xd9   : > { %2617 = shalt.err (!%p2614_p2)
}
  0xda   : > { %s2618_s12 = scalar_lea.vmem %s3202_s26, 128  ;;  %s2814_s16 = smov [#allocation11]  }
  0xdb   : > { %p2619_p6 = scmp.ne.s32.totalorder %s3202_s26, %s2618_s12  ;;  %s2623_s14 = sshll.u32 %s2814_s16, 4  ;;  %s2624_s14 = int_to_ptr.vmem [resolvable:$false] %s2623_s14 }
  0xdc   : > { %s2625_s8 = scalar_lea.vmem %s2624_s14, 256  ;;  %p2626_p10 = scmp.lt.s32.totalorder %s3202_s26, %s2624_s14 }
  0xdd   : > { %p2621_p4 = pnand %p2619_p6, %p2605_p0  ;;  %p2627_p3 = scmp.lt.s32.totalorder %s2625_s8, %s2618_s12 }
  0xdf   : > { %p2622_p5 = pneg %p2621_p4  ;;  %p2628_p9 = por %p2627_p3, %p2626_p10 }
  0xe1   : > { %p2629_p8 = pnand %p2628_p9, %p2622_p5 }
  0xe3   : > { %2632 = shalt.err (!%p2629_p8)
}
  0xe4   : > { %2299 = dma.hbm_to_vmem [thread:$0]  (!%p3598_p12), %s3198_s9, 128, %s3202_s26, %s3105_s5  }
  0xe5   : > { %s3599_s21 = sand.u32 1, %s2805_s23   ;;  %s2633_s7 = scalar_lea.hbm %s3209_s27, 128 }
  0xe6   : > { %s528_s25 = scalar_lea.sflag [#allocation13], %s3599_s21  ;;  %p2634_p7 = scmp.ne.s32.totalorder %s3209_s27, %s2633_s7 }
  0xe7   : > { %s2638_s1 = scalar_lea.hbm %s3518_s3, 512  ;;  %p2639_p11 = scmp.lt.u32.totalorder %s3209_s27, %s3518_s3 }
  0xe8   : > { %p2636_p13 = pnand %p2634_p7, %p2605_p0  ;;  %p2640_p2 = scmp.lt.u32.totalorder %s2638_s1, %s2633_s7 }
  0xe9   : > { %p2642_p4 = scmp.lt.u32.totalorder %s2633_s7, %s3209_s27 }
  0xea   : > { %p2637_p1 = pneg %p2636_p13  ;;  %p2641_p6 = por %p2640_p2, %p2639_p11 }
  0xec   : > { %p2643_p5 = por %p2642_p4, %p2641_p6 }
  0xee   : > { %p2644_p10 = pnand %p2643_p5, %p2637_p1 }
  0xf0   : > { %2647 = shalt.err (!%p2644_p10)
}
  0xf1   : > { %s2648_s5 = scalar_lea.vmem %s541_s0, 128  ;;  %s2815_s9 = smov [#allocation12]  }
  0xf2   : > { %p2649_p3 = scmp.ne.s32.totalorder %s541_s0, %s2648_s5  ;;  %s2653_s26 = sshll.u32 %s2815_s9, 4  ;;  %s2654_s26 = int_to_ptr.vmem [resolvable:$false] %s2653_s26 }
  0xf3   : > { %s2655_s16 = scalar_lea.vmem %s2654_s26, 256  ;;  %p2656_p7 = scmp.lt.s32.totalorder %s541_s0, %s2654_s26 }
  0xf4   : > { %p2651_p9 = pnand %p2649_p3, %p2605_p0  ;;  %p2657_p13 = scmp.lt.s32.totalorder %s2655_s16, %s2648_s5 }
  0xf6   : > { %p2652_p8 = pneg %p2651_p9  ;;  %p2658_p2 = por %p2657_p13, %p2656_p7 }
  0xf8   : > { %p2659_p11 = pnand %p2658_p2, %p2652_p8 }
  0xfa   : > { %2662 = shalt.err (!%p2659_p11)
}
  0xfb   : > { %2302 = dma.hbm_to_vmem [thread:$0]  (!%p3598_p12), %s3209_s27, 128, %s541_s0, %s528_s25  }
  0xfc   : > { %s3600_s14 = sld [smem:[#allocation31_spill]] }
 0x102   : > { %p3601_p1 = scmp.ne.s32.totalorder %s3600_s14, 0 }
 0x103   : > { %s3272_s8 = sand.u32 (!%p3601_p1), 1, %s2781_s17   ;;  %p3602_p0 = scmp.ne.s32.totalorder (!%p3601_p1), %s3578_s11, 0 }
 0x104   : > { %549 = sbr.rel (%p3601_p1) target bundleno = 2459 (0x99b), region = 76  ;;  %s3275_s21 = sshll.u32 (!%p3601_p1), %s3272_s8, 3 }
 0x105   : > { %s552_s7 = scalar_lea.sflag (!%p3601_p1), [#allocation7], %s3272_s8  ;;  %s555_s20 = scalar_lea.vmem (!%p3601_p1), [#allocation6], %s3275_s21 }
 0x10b   : > { %2736 = dma.done.wait (%p3602_p0), %s552_s7, 128  }
 0x10c   : > { %2738 = vsyncadd (%p3602_p0), %s552_s7, 4294967168  ;;  %s560_s0 = sand.u32 1, %s2967_s24   ;;  %s564_s27 = scalar_lea.vmem [#allocation9], %s3275_s21 }
 0x10d   : > { %s561_s4 = scalar_lea.sflag [#allocation10], %s560_s0 }
 0x10e   : > { %2740 = dma.done.wait (%p3602_p0), %s561_s4, 128  }
 0x10f   : > { %2742 = vsyncadd (%p3602_p0), %s561_s4, 4294967168  ;;  %s3603_s25 = sld [smem:[#allocation30_spill]]  ;;  %s571_s28 = sand.u32 1, %s2769_s30  }
 0x110   : > { %s3290_s1 = sshll.u32 %s571_s28, 3 }
 0x111   : > { %s573_s29 = scalar_lea.vmem [#allocation11], %s3290_s1 }
 0x115   : > { %p3604_p12 = scmp.ne.s32.totalorder %s3603_s25, 0 }
 0x117   : > { %2744 = dma.done.wait (%p3604_p12), %s561_s4, 128  }
 0x118   : > { %2746 = vsyncadd (%p3604_p12), %s561_s4, 4294967168  ;;  %s579_s12 = scalar_lea.sflag [#allocation13], %s560_s0  ;;  %s582_s5 = scalar_lea.vmem [#allocation12], %s3290_s1 }
 0x119   : > { %2748 = dma.done.wait (%p3604_p12), %s579_s12, 128  }
 0x11a   : > { %2750 = vsyncadd (%p3604_p12), %s579_s12, 4294967168  ;;  %p3605_p6 = scmp.eq.s32.totalorder %s2967_s24, 0 }
 0x11c   : > { %2752 = dma.done.wait (%p3605_p6), [#allocation13], 512   ;;  %p3606_p4 = pmov %p3605_p6 }
 0x11e   : > { %2754 = vsyncadd (%p3606_p4), [#allocation13], 4294966784  ;;  %p3607_p5 = pmov %p3606_p4 }
 0x11f   : > { %p3608_p10 = pmov %p3606_p4 }
 0x120   : > { %2756 = dma.done.wait (%p3607_p5), [#allocation16], 1024  }
 0x121   : > { %2758 = vsyncadd (%p3608_p10), [#allocation16], 4294966272  ;;  %s653_s11 = scalar_lea.vmem [#allocation18], %s3275_s21  ;;  %s3609_s9 = sld [smem:[#allocation27_spill]] }
 0x127   : > { %p2086_p3 = scmp.ne.s32.totalorder %s3609_s9, 0 }
 0x128   : > { %v661_v0 = vld [vmem:[#allocation14] sm:$0xff] (!%p2086_p3)  ;;  %v662_v1 = vld [vmem:[#allocation14 + $0x8] sm:$0xff] (!%p2086_p3)  ;;  %v663_v2 = vld [vmem:[#allocation14 + $0x10] sm:$0xff] (!%p2086_p3)  ;;  %v2816_v3 = vmov (!%p2086_p3), 0.0|0.0   ;;  %vm2817_vm0 = vmmov (!%p2086_p3), 0   ;;  %v2818_v6 = vmov (!%p2086_p3), 0.0  }
 0x129   : > { %657 = sbr.rel (%p2086_p3) target bundleno = 640 (0x280), region = 108  ;;  %2234 = vmatprep.subr.bf16.mxu0 (!%p2086_p3), %v2816_v3  ;;  %v2235_v4 = vpack.c.bf16 (!%p2086_p3), %v662_v1, %v661_v0  ;;  %v664_v5 = vld [vmem:[#allocation14 + $0x18] sm:$0xff] (!%p2086_p3)  ;;  %2158 = vmatprep.mubr.msk.f32.mxu0 (!%p2086_p3), %vm2817_vm0, %v2818_v6  ;;  %vm761_vm1 = vcmask (!%p2086_p3), 7168   ;;  %v2819_v7 = vmov (!%p2086_p3), -inf   ;;  %v658_v9 = vld [vmem:[%s555_s20] sm:$0xff] (!%p2086_p3)  ;;  %vm672_vm2 = vcmask (!%p2086_p3), 261120  }
 0x12a   : > { %762 = vst.msk [vmem:[#allocation3] sm:$0xff] (!%p2086_p3), %vm761_vm1, %v2819_v7  ;;  %763 = vst.msk [vmem:[#allocation3 + $0x8] sm:$0xff] (!%p2086_p3), %vm761_vm1, %v2819_v7  ;;  %v2238_v8 = vpack.c.bf16 (!%p2086_p3), %v664_v5, %v663_v2  ;;  %v659_v10 = vld [vmem:[%s564_s27] sm:$0xff] (!%p2086_p3)  ;;  %vm756_vm3 = vcmask (!%p2086_p3), 64512   ;;  %s3610_s16 = sld [smem:[#allocation39_spill]] (!%p2086_p3)  ;;  %s2820_s14 = smov (!%p2086_p3), 104  }
 0x12b   : > { %764 = vst.msk [vmem:[#allocation3 + $0x10] sm:$0xff] (!%p2086_p3), %vm761_vm1, %v2819_v7  ;;  %765 = vst.msk [vmem:[#allocation3 + $0x18] sm:$0xff] (!%p2086_p3), %vm761_vm1, %v2819_v7  ;;  %2236 = vmatpush3.bf16.msra.mxu0 (!%p2086_p3), %v2235_v4  ;;  %v660_v11 = vadd.f32 (!%p2086_p3), %v659_v10, %v658_v9  ;;  %s2821_s7 = smov (!%p2086_p3), 120   ;;  %s2822_s0 = smov (!%p2086_p3), 112  }
 0x12c   : > { %766 = vst.msk [vmem:[#allocation4] sm:$0xff] (!%p2086_p3), %vm761_vm1, %v2818_v6  ;;  %767 = vst.msk [vmem:[#allocation4 + $0x8] sm:$0xff] (!%p2086_p3), %vm761_vm1, %v2818_v6  ;;  %2237 = vmatprep.subr.bf16.mxu0 (!%p2086_p3), %v2816_v3 }
 0x12d   : > { %768 = vst.msk [vmem:[#allocation4 + $0x10] sm:$0xff] (!%p2086_p3), %vm761_vm1, %v2818_v6  ;;  %769 = vst.msk [vmem:[#allocation4 + $0x18] sm:$0xff] (!%p2086_p3), %vm761_vm1, %v2818_v6 }
 0x12e   : > { %770 = vst.msk [vmem:[#allocation5] sm:$0xff] (!%p2086_p3), %vm756_vm3, %v2818_v6  ;;  %771 = vst.msk [vmem:[#allocation5 + $0x8] sm:$0xff] (!%p2086_p3), %vm756_vm3, %v2818_v6 }
 0x12f   : > { %2239 = vmatpush3.bf16.msra.mxu0 (!%p2086_p3), %v2238_v8  ;;  %772 = vst.msk [vmem:[#allocation5 + $0x10] sm:$0xff] (!%p2086_p3), %vm756_vm3, %v2818_v6  ;;  %773 = vst.msk [vmem:[#allocation5 + $0x18] sm:$0xff] (!%p2086_p3), %vm756_vm3, %v2818_v6 }
 0x130   : > { %v2087_v12 = vld [vmem:[%s3610_s16] ss:$0 sm:$0xff] }
 0x132   : > { %2159 = vmatmul.mubr.msk.f32.vlgmr.msra.gmra.mrb[0].mxu0 %vm672_vm2, %v660_v11 }
 0x205   : > { %v742_v13 = vpop.f32.mrb[0].mxu0 }
 0x206   : > { %v743_v14 = vadd.f32 %v2087_v12, %v742_v13  ;;  %v2160_v15 = vpop.f32.mrb[1].mxu0 }
 0x208   : > { %757 = vst.msk [vmem:[#allocation2] sm:$0xff] %vm756_vm3, %v743_v14  ;;  %753 = vrot.lane.b32.xlu1 %v743_v14, %s2820_s14  ;;  %747 = vrot.lane.b32.xlu0 %v743_v14, %s2821_s7 }
 0x20c   : > { %750 = vrot.lane.b32.xlu0 %v743_v14, %s2822_s0 }
 0x27a   : > { %v754_v16 = vpop.permute.xlu1 %753  ;;  %v748_v17 = vpop.permute.xlu0 %747 }
 0x27b   : > { %760 = vst.msk [vmem:[#allocation2 + $0x18] sm:$0xff] %vm756_vm3, %v754_v16  ;;  %758 = vst.msk [vmem:[#allocation2 + $0x8] sm:$0xff] %vm756_vm3, %v748_v17 }
 0x27e   : > { %v751_v18 = vpop.permute.xlu0 %750 }
 0x27f   : > { %759 = vst.msk [vmem:[#allocation2 + $0x10] sm:$0xff] %vm756_vm3, %v751_v18 }
 0x280 PF: > { %v777_v19 = vld [vmem:[#allocation15] sm:$0xff]  ;;  %v778_v20 = vld [vmem:[#allocation15 + $0x8] sm:$0xff]  ;;  %v779_v21 = vld [vmem:[#allocation15 + $0x10] sm:$0xff]  ;;  %v2823_v22 = vmov 0.0|0.0   ;;  %vm2824_vm4 = vmmov 0   ;;  %v2825_v25 = vmov 0.0  }
 0x281   : > { %2240 = vmatprep.subr.bf16.mxu0 %v2823_v22  ;;  %v2241_v23 = vpack.c.bf16 %v778_v20, %v777_v19  ;;  %v780_v24 = vld [vmem:[#allocation15 + $0x18] sm:$0xff]  ;;  %2169 = vmatprep.mubr.msk.f32.mxu0 %vm2824_vm4, %v2825_v25  ;;  %v774_v27 = vld [vmem:[%s573_s29] sm:$0xff]  ;;  %vm788_vm5 = vcmask 261120   ;;  %v864_v32 = vld [vmem:[#allocation17 + $0x10] sm:$0xff]  ;;  %s3611_s25 = sld [smem:[#allocation40_spill]]  ;;  %vm967_vm6 = vcmask 64512  }
 0x282   : > { %2246 = vmatprep.subr.bf16.mxu1 %v2823_v22  ;;  %2180 = vmatprep.mubr.msk.f32.mxu1 %vm2824_vm4, %v2825_v25  ;;  %v2244_v26 = vpack.c.bf16 %v780_v24, %v779_v21  ;;  %v775_v28 = vld [vmem:[%s582_s5] sm:$0xff]  ;;  %v862_v30 = vld [vmem:[#allocation17] sm:$0xff]  ;;  %v863_v31 = vld [vmem:[#allocation17 + $0x8] sm:$0xff]  ;;  %s2826_s28 = smov 104   ;;  %s2827_s1 = smov 120   ;;  %v2829_v54 = vmov 0  }
 0x283   : > { %2242 = vmatpush3.bf16.msra.mxu0 %v2241_v23  ;;  %v776_v29 = vadd.f32 %v775_v28, %v774_v27  ;;  %v2247_v33 = vpack.c.bf16 %v863_v31, %v862_v30  ;;  %v865_v34 = vld [vmem:[#allocation17 + $0x18] sm:$0xff]  ;;  %v963_v40 = vld [vmem:[#allocation2] sm:$0xff]  ;;  %s2828_s29 = smov 112   ;;  %v964_v44 = vld [vmem:[#allocation2 + $0x8] sm:$0xff]  ;;  %s3612_s9 = sld [smem:[#allocation41_spill]]  ;;  %2429 = vset.pattern.permute.xlu0 %v2829_v54  ;;  %vm1356_vm7 = vcmask 7168  }
 0x284   : > { %2243 = vmatprep.subr.bf16.mxu0 %v2823_v22  ;;  %v2250_v35 = vpack.c.bf16 %v865_v34, %v864_v32  ;;  %v966_v49 = vld [vmem:[#allocation2 + $0x18] sm:$0xff]  ;;  %2430 = vset.pattern.permute.xlu1 %v2829_v54  ;;  %v1268_v0 = vld [vmem:[#allocation3] sm:$0xff]  ;;  %v3378_v4 = vld [vmem:[#allocation3 + $0x8] sm:$0xff]  ;;  %s3613_s24 = sld [smem:[#allocation27_spill]] }
 0x285   : > { %2248 = vmatpush3.bf16.msra.mxu1 %v2247_v33  ;;  %v1270_v7 = vld [vmem:[#allocation3 + $0x10] sm:$0xff]  ;;  %v3383_v8 = vld [vmem:[#allocation3 + $0x18] sm:$0xff] }
 0x286   : > { %2249 = vmatprep.subr.bf16.mxu1 %v2823_v22  ;;  %v965_v48 = vld [vmem:[#allocation2 + $0x10] sm:$0xff] }
 0x287   : > { %2245 = vmatpush3.bf16.msra.mxu0 %v2244_v26  ;;  %v2089_v36 = vld [vmem:[%s3611_s25] ss:$0 sm:$0xff] }
 0x288   : > { %2183 = vmatprep.subr.mxu0 %v2825_v25 }
 0x289   : > { %2251 = vmatpush3.bf16.msra.mxu1 %v2250_v35  ;;  %v2091_v45 = vld [vmem:[%s3612_s9] ss:$0 sm:$0xff] }
 0x28a   : > { %2170 = vmatmul.mubr.msk.f32.vlgmr.msra.gmra.mrb[0].mxu0 %vm788_vm5, %v776_v29  ;;  %2188 = vmatprep.subr.mxu1 %v2825_v25  ;;  %p2105_p9 = scmp.ne.s32.totalorder %s3613_s24, 1 }
 0x28b   : > { %2185 = vmatprep.mubr.msk.f32.mxu0 %vm2824_vm4, %v2825_v25  ;;  %s3614_s14 = sld [smem:[#allocation42_spill]] (!%p2105_p9)  ;;  %vm2832_vm8 = vmmov (!%p2105_p9), 0   ;;  %s2836_s12 = smov (!%p2105_p9), 24   ;;  %vm1746_vm9 = vcmask (!%p2105_p9), 130048   ;;  %vm1748_vm10 = vcmask (!%p2105_p9), 195584  }
 0x28c   : > { %2181 = vmatmul.mubr.msk.f32.vlgmr.msra.gmra.mrb[0].mxu1 %vm788_vm5, %v774_v27  ;;  %s3615_s24 = sld [smem:[#allocation43_spill]] (!%p2105_p9)  ;;  %s3616_s16 = sld [smem:[#allocation44_spill]] (!%p2105_p9) }
 0x28d   : > { %2190 = vmatprep.mubr.msk.f32.mxu1 %vm2824_vm4, %v2825_v25  ;;  %s3617_s4 = sld [smem:[#allocation45_spill]] (!%p2105_p9) }
 0x35d   : > { %v858_v37 = vpop.f32.mrb[0].mxu0 }
 0x35e   : > { %v859_v38 = vadd.f32 %v2089_v36, %v858_v37  ;;  %v2171_v39 = vpop.f32.mrb[1].mxu0 }
 0x35f   : > { %v942_v41 = vpop.f32.mrb[0].mxu1 }
 0x360   : > { %951 = vrot.lane.b32.xlu1 %v859_v38, %s2826_s28  ;;  %947 = vrot.lane.b32.xlu0 %v859_v38, %s2827_s1  ;;  %v2182_v42 = vpop.f32.mrb[1].mxu1  ;;  %v943_v50 = vadd.f32 %v2091_v45, %v942_v41 }
 0x361   : > { %2184 = vmatpush3.xpose.msk.msra.mxu0 %vm967_vm6, %v859_v38 }
 0x362   : > { %2193 = vmatprep.subr.mxu0 %v2825_v25 }
 0x364   : > { %2186 = vmatmul.mubr.msk.f32.vlgmr.msra.gmra.mrb[2].mxu0 %vm967_vm6, %v963_v40  ;;  %949 = vrot.lane.b32.xlu0 %v859_v38, %s2828_s29 }
 0x365   : > { %2195 = vmatprep.mubr.msk.f32.mxu0 %vm2824_vm4, %v2825_v25 }
 0x3d2   : > { %v948_v43 = vpop.permute.xlu0 %947  ;;  %v952_v46 = vpop.permute.xlu1 %951 }
 0x3d3   : > { %2189 = vmatpush3.xpose.msk.msra.mxu1 %vm967_vm6, %v948_v43 }
 0x3d4   : > { %2198 = vmatprep.subr.mxu1 %v2825_v25 }
 0x3d6   : > { %2191 = vmatmul.mubr.msk.f32.vlgmr.msra.gmra.mrb[2].mxu1 %vm967_vm6, %v964_v44  ;;  %v950_v47 = vpop.permute.xlu0 %949 }
 0x3d7   : > { %2194 = vmatpush3.xpose.msk.msra.mxu0 %vm967_vm6, %v950_v47  ;;  %2199 = vmatpush3.xpose.msk.msra.mxu1 %vm967_vm6, %v952_v46 }
 0x3d8   : > { %2200 = vmatprep.mubr.msk.f32.mxu1 %vm2824_vm4, %v2825_v25  ;;  %2203 = vmatprep.subr.mxu0 %v2825_v25 }
 0x3d9   : > { %2208 = vmatprep.subr.mxu1 %v2825_v25 }
 0x3da   : > { %2196 = vmatmul.mubr.msk.f32.vlgmr.msra.gmra.mrb[4].mxu0 %vm967_vm6, %v965_v48  ;;  %2201 = vmatmul.mubr.msk.f32.vlgmr.msra.gmra.mrb[4].mxu1 %vm967_vm6, %v966_v49  ;;  %v1332_v48 = vld [vmem:[#allocation4] sm:$0xff] }
 0x3db   : > { %2204 = vmatpush3.msra.mxu0 %v943_v50  ;;  %2205 = vmatprep.mubr.msk.f32.mxu0 %vm2824_vm4, %v2825_v25 }
 0x3dc   : > { %2210 = vmatprep.mubr.msk.f32.mxu1 %vm2824_vm4, %v2825_v25  ;;  %2213 = vmatprep.subr.mxu0 %v2825_v25 }
 0x437   : > { %v1039_v51 = vpop.f32.mrb[2].mxu0 }
 0x438   : > { %v1272_v52 = vsel %vm967_vm6, %v1039_v51, -inf  ;;  %v2187_v53 = vpop.f32.mrb[3].mxu0 }
 0x439   : > { %1273 = vmax.xlane.f32.xlu1 %v1272_v52  ;;  %v1361_v52 = vld [vmem:[#allocation5] sm:$0xff] }
 0x4a9   : > { %v1114_v55 = vpop.f32.mrb[2].mxu1 }
 0x4aa   : > { %v2192_v56 = vpop.f32.mrb[3].mxu1  ;;  %v1275_v57 = vsel %vm967_vm6, %v1114_v55, -inf }
 0x4ab   : > { %1276 = vmax.xlane.f32.xlu0 %v1275_v57  ;;  %v1333_v57 = vld [vmem:[#allocation4 + $0x8] sm:$0xff] }
 0x4ad   : > { %v1189_v58 = vpop.f32.mrb[4].mxu0  ;;  %v1264_v59 = vpop.f32.mrb[4].mxu1 }
 0x4ae   : > { %v2197_v60 = vpop.f32.mrb[5].mxu0  ;;  %v1278_v61 = vsel %vm967_vm6, %v1189_v58, -inf  ;;  %v2202_v62 = vpop.f32.mrb[5].mxu1  ;;  %v1281_v63 = vsel %vm967_vm6, %v1264_v59, -inf }
 0x4af   : > { %1279 = vmax.xlane.f32.xlu0 %v1278_v61  ;;  %1282 = vmax.xlane.f32.xlu1 %v1281_v63  ;;  %v1334_v60 = vld [vmem:[#allocation4 + $0x10] sm:$0xff] }
 0x4c6   : > { %v1274_v1 = vpop.xlane.xlu1 %1273 }
 0x4c7   : > { %v1284_v2 = vmax.f32 %v1268_v0, %v1274_v1 }
 0x4c9   : > { %v1288_v3 = vsub.f32 %v1268_v0, %v1284_v2  ;;  %1689 = vst.msk [vmem:[#allocation3] sm:$0xff] %vm1356_vm7, %v1284_v2  ;;  %1302 = vperm.xlu0 %2429, %v1284_v2   ;;  %v1335_v0 = vld [vmem:[#allocation4 + $0x18] sm:$0xff] }
 0x4cb   : > { %v1292_v16 = vmul.f32 1.442695, %v1288_v3 }
 0x4cd   : > { %2431 = vpow2.f32 %v1292_v16 }
 0x4d7   : > { %v2432_v20 = vpop.eup %2431 }
 0x4d8   : > { %v1336_v49 = vmul.f32 %v2432_v20, %v1332_v48 }
 0x538   : > { %v1277_v5 = vpop.xlane.xlu0 %1276 }
 0x539   : > { %v3381_v6 = vmax.f32 %v3378_v4, %v1277_v5  ;;  %v1362_v5 = vld [vmem:[#allocation5 + $0x8] sm:$0xff] }
 0x53b   : > { %v1289_v9 = vsub.f32 %v3378_v4, %v3381_v6  ;;  %1690 = vst.msk [vmem:[#allocation3 + $0x8] sm:$0xff] %vm1356_vm7, %v3381_v6  ;;  %1307 = vperm.xlu1 %2430, %v3381_v6  }
 0x53c   : > { %v1280_v10 = vpop.xlane.xlu0 %1279  ;;  %v1283_v11 = vpop.xlane.xlu1 %1282 }
 0x53d   : > { %v1286_v12 = vmax.f32 %v1270_v7, %v1280_v10  ;;  %v1287_v13 = vmax.f32 %v3383_v8, %v1283_v11 }
 0x53f   : > { %v1290_v14 = vsub.f32 %v1270_v7, %v1286_v12  ;;  %1691 = vst.msk [vmem:[#allocation3 + $0x10] sm:$0xff] %vm1356_vm7, %v1286_v12  ;;  %1312 = vperm.xlu1 %2430, %v1286_v12   ;;  %v1291_v15 = vsub.f32 %v3383_v8, %v1287_v13  ;;  %1692 = vst.msk [vmem:[#allocation3 + $0x18] sm:$0xff] %vm1356_vm7, %v1287_v13 }
 0x541   : > { %v1296_v41 = vmul.f32 1.442695, %v1290_v14  ;;  %v1298_v43 = vmul.f32 1.442695, %v1291_v15  ;;  %v1364_v14 = vld [vmem:[#allocation5 + $0x18] sm:$0xff] }
 0x543   : > { %1317 = vperm.xlu1 %2430, %v1287_v13  }
 0x547   : > { %954 = vrot.lane.b32.xlu1 %v943_v50, %s2827_s1  ;;  %s2834_s1 = smov (!%p2105_p9), 8  }
 0x548   : > { %v1303_v17 = vpop.permute.xlu0 %1302 }
 0x549   : > { %v1320_v18 = vsub.f32 %v1039_v51, %v1303_v17 }
 0x54b   : > { %v1324_v19 = vmul.f32 1.442695, %v1320_v18  ;;  %957 = vrot.lane.b32.xlu1 %v943_v50, %s2828_s29  ;;  %s2835_s29 = smov (!%p2105_p9), 16  }
 0x54d   : > { %2433 = vpow2.f32 %v1324_v19 }
 0x54f   : > { %960 = vrot.lane.b32.xlu1 %v943_v50, %s2826_s28 }
 0x553   : > { %1367 = vperm.xlu1 %2430, %v2432_v20  }
 0x557   : > { %v2434_v21 = vpop.eup %2433 }
 0x558   : > { %2206 = vmatmul.mubr.msk.f32.vlgmr.msra.gmra.mrb[6].mxu0 %vm967_vm6, %v2434_v21  ;;  %v1340_v22 = vsel %vm967_vm6, %v2434_v21, 0.0 }
 0x559   : > { %2215 = vmatprep.mubr.msk.f32.mxu0 %vm2824_vm4, %v2825_v25 }
 0x577   : > { %1341 = vadd.xlane.f32.xlu1 %v1340_v22 }
 0x5ba   : > { %v1308_v23 = vpop.permute.xlu1 %1307 }
 0x5bb   : > { %v1321_v24 = vsub.f32 %v1114_v55, %v1308_v23 }
 0x5bd   : > { %v1326_v26 = vmul.f32 1.442695, %v1321_v24 }
 0x5be   : > { %v1313_v27 = vpop.permute.xlu1 %1312 }
 0x5bf   : > { %2435 = vpow2.f32 %v1326_v26  ;;  %v1322_v28 = vsub.f32 %v1189_v58, %v1313_v27  ;;  %v2830_v27 = vmov (!%p2105_p9), 0  }
 0x5c1   : > { %v1328_v29 = vmul.f32 1.442695, %v1322_v28 }
 0x5c2   : > { %v1318_v30 = vpop.permute.xlu1 %1317 }
 0x5c3   : > { %2437 = vpow2.f32 %v1328_v29  ;;  %v1323_v31 = vsub.f32 %v1264_v59, %v1318_v30 }
 0x5c5   : > { %v1330_v32 = vmul.f32 1.442695, %v1323_v31 }
 0x5c6   : > { %v955_v33 = vpop.permute.xlu1 %954 }
 0x5c7   : > { %2439 = vpow2.f32 %v1330_v32  ;;  %2209 = vmatpush3.msra.mxu1 %v955_v33  ;;  %v1750_v33 = vld [vmem:[%s3614_s14] sm:$0xff] (!%p2105_p9) }
 0x5c8   : > { %2218 = vmatprep.subr.mxu1 %v2825_v25  ;;  %2441 = vpow2.f32 %v1296_v41 }
 0x5c9   : > { %v2436_v34 = vpop.eup %2435  ;;  %2443 = vpow2.f32 %v1298_v43 }
 0x5ca   : > { %2211 = vmatmul.mubr.msk.f32.vlgmr.msra.gmra.mrb[6].mxu1 %vm967_vm6, %v2436_v34  ;;  %v958_v35 = vpop.permute.xlu1 %957  ;;  %v1343_v36 = vsel %vm967_vm6, %v2436_v34, 0.0  ;;  %v1751_v34 = vld [vmem:[%s3614_s14 + $0x8] sm:$0xff] (!%p2105_p9) }
 0x5cb   : > { %1344 = vadd.xlane.f32.xlu0 %v1343_v36  ;;  %2214 = vmatpush3.msra.mxu0 %v958_v35  ;;  %v2831_v35 = vmov (!%p2105_p9), 0.0|0.0   ;;  %v2253_v36 = vpack.c.bf16 (!%p2105_p9), %v1751_v34, %v1750_v33 }
 0x5cc   : > { %2220 = vmatprep.mubr.msk.f32.mxu1 %vm2824_vm4, %v2825_v25  ;;  %v1294_v25 = vmul.f32 1.442695, %v1289_v9  ;;  %v1363_v9 = vld [vmem:[#allocation5 + $0x10] sm:$0xff]  ;;  %2252 = vmatprep.subr.bf16.mxu0 (!%p2105_p9), %v2831_v35 }
 0x5cd   : > { %v2438_v37 = vpop.eup %2437 }
 0x5ce   : > { %v961_v38 = vpop.permute.xlu1 %960  ;;  %2216 = vmatmul.mubr.msk.f32.vlgmr.msra.gmra.mrb[8].mxu0 %vm967_vm6, %v2438_v37  ;;  %v1346_v39 = vsel %vm967_vm6, %v2438_v37, 0.0  ;;  %2445 = vpow2.f32 %v1294_v25  ;;  %v1752_v37 = vld [vmem:[%s3614_s14 + $0x10] sm:$0xff] (!%p2105_p9) }
 0x5cf   : > { %2219 = vmatpush3.msra.mxu1 %v961_v38  ;;  %1347 = vadd.xlane.f32.xlu1 %v1346_v39  ;;  %v1753_v38 = vld [vmem:[%s3614_s14 + $0x18] sm:$0xff] (!%p2105_p9) }
 0x5d0   : > { %2254 = vmatpush3.bf16.msra.mxu0 (!%p2105_p9), %v2253_v36  ;;  %v2256_v39 = vpack.c.bf16 (!%p2105_p9), %v1753_v38, %v1752_v37 }
 0x5d1   : > { %v2440_v40 = vpop.eup %2439  ;;  %2255 = vmatprep.subr.bf16.mxu0 (!%p2105_p9), %v2831_v35 }
 0x5d2   : > { %2221 = vmatmul.mubr.msk.f32.vlgmr.msra.gmra.mrb[8].mxu1 %vm967_vm6, %v2440_v40  ;;  %v1349_v42 = vsel %vm967_vm6, %v2440_v40, 0.0  ;;  %v2442_v44 = vpop.eup %2441  ;;  %v1368_v47 = vpop.permute.xlu1 %1367  ;;  %v2833_v40 = vmov (!%p2105_p9), 0.0  }
 0x5d3   : > { %1350 = vadd.xlane.f32.xlu0 %v1349_v42  ;;  %v2444_v45 = vpop.eup %2443  ;;  %v1385_v53 = vmul.f32 %v1368_v47, %v1361_v52  ;;  %v1338_v62 = vmul.f32 %v2442_v44, %v1334_v60  ;;  %2231 = vmatprep.mubr.msk.f32.mxu0 (!%p2105_p9), %vm2832_vm8, %v2833_v40  ;;  %v1834_v60 = vld [vmem:[%s555_s20] sm:$0xff] (!%p2105_p9) }
 0x5d4   : > { %v1339_v2 = vmul.f32 %v2444_v45, %v1335_v0  ;;  %2257 = vmatpush3.bf16.msra.mxu0 (!%p2105_p9), %v2256_v39 }
 0x5d8   : > { %v2446_v46 = vpop.eup %2445 }
 0x5d9   : > { %v1337_v58 = vmul.f32 %v2446_v46, %v1333_v57 }
 0x5e0   : > { %1377 = vperm.xlu1 %2430, %v2442_v44  }
 0x5e4   : > { %1382 = vperm.xlu1 %2430, %v2444_v45  }
 0x5e8   : > { %2448 = vset.pattern.permute.xlu1 (!%p2105_p9), %v2830_v27 }
 0x5e9   : > { %1372 = vperm.xlu0 %2429, %v2446_v46  }
 0x5ed   : > { %2447 = vset.pattern.permute.xlu0 (!%p2105_p9), %v2830_v27 }
 0x604   : > { %v1342_v50 = vpop.xlane.xlu1 %1341 }
 0x605   : > { %v1352_v51 = vadd.f32 %v1342_v50, %v1336_v49 }
 0x607   : > { %1357 = vst.msk [vmem:[#allocation4] sm:$0xff] %vm1356_vm7, %v1352_v51 }
 0x60e   : > { %v1701_v28 = vld [vmem:[#allocation4] sm:$0xff] (!%p2105_p9) }
 0x62b   : > { %v1458_v54 = vpop.f32.mrb[6].mxu0 }
 0x62c   : > { %v1681_v55 = vadd.f32 %v1458_v54, %v1385_v53  ;;  %v2207_v56 = vpop.f32.mrb[7].mxu0 }
 0x62e   : > { %1685 = vst.msk [vmem:[#allocation5] sm:$0xff] %vm967_vm6, %v1681_v55 }
 0x635   : > { %v1697_v50 = vld [vmem:[#allocation5] sm:$0xff] (!%p2105_p9) }
 0x658   : > { %v1345_v59 = vpop.xlane.xlu0 %1344 }
 0x659   : > { %v1353_v61 = vadd.f32 %v1345_v59, %v1337_v58  ;;  %v2106_v58 = vld [vmem:[%s3615_s24] ss:$0 sm:$0xff] (!%p2105_p9) }
 0x65b   : > { %1358 = vst.msk [vmem:[#allocation4 + $0x8] sm:$0xff] %vm1356_vm7, %v1353_v61 }
 0x65c   : > { %v1348_v63 = vpop.xlane.xlu1 %1347 }
 0x65d   : > { %v1354_v1 = vadd.f32 %v1348_v63, %v1338_v62 }
 0x65f   : > { %1359 = vst.msk [vmem:[#allocation4 + $0x10] sm:$0xff] %vm1356_vm7, %v1354_v1 }
 0x660   : > { %v1351_v3 = vpop.xlane.xlu0 %1350  ;;  %v1378_v7 = vpop.permute.xlu1 %1377 }
 0x661   : > { %v1355_v4 = vadd.f32 %v1351_v3, %v1339_v2  ;;  %v1387_v13 = vmul.f32 %v1378_v7, %v1363_v9 }
 0x662   : > { %v1702_v23 = vld [vmem:[#allocation4 + $0x8] sm:$0xff] (!%p2105_p9) }
 0x663   : > { %1360 = vst.msk [vmem:[#allocation4 + $0x18] sm:$0xff] %vm1356_vm7, %v1355_v4  ;;  %2449 = vrcp.f32 (!%p2105_p9), %v1702_v23 }
 0x664   : > { %v1383_v15 = vpop.permute.xlu1 %1382 }
 0x665   : > { %v1388_v19 = vmul.f32 %v1383_v15, %v1364_v14 }
 0x666   : > { %v1703_v26 = vld [vmem:[#allocation4 + $0x10] sm:$0xff] (!%p2105_p9) }
 0x668   : > { %v1373_v6 = vpop.permute.xlu0 %1372 }
 0x669   : > { %v1386_v8 = vmul.f32 %v1373_v6, %v1362_v5 }
 0x66a   : > { %v1704_v24 = vld [vmem:[#allocation4 + $0x18] sm:$0xff] (!%p2105_p9) }
 0x66b   : > { %2451 = vrcp.f32 (!%p2105_p9), %v1704_v24 }
 0x66c   : > { %2453 = vrcp.f32 (!%p2105_p9), %v1703_v26 }
 0x66d   : > { %2455 = vrcp.f32 (!%p2105_p9), %v1701_v28  ;;  %v2450_v29 = vpop.eup (!%p2105_p9), %2449 }
 0x66e   : > { %1716 = vperm.xlu0 (!%p2105_p9), %2447, %v2450_v29  }
 0x675   : > { %v2452_v30 = vpop.eup (!%p2105_p9), %2451 }
 0x676   : > { %v2454_v31 = vpop.eup (!%p2105_p9), %2453  ;;  %1726 = vperm.xlu1 (!%p2105_p9), %2448, %v2452_v30  }
 0x677   : > { %v2456_v32 = vpop.eup (!%p2105_p9), %2455  ;;  %1721 = vperm.xlu0 (!%p2105_p9), %2447, %v2454_v31  }
 0x67a   : > { %1711 = vperm.xlu1 (!%p2105_p9), %2448, %v2456_v32  }
 0x69d   : > { %v1531_v10 = vpop.f32.mrb[6].mxu1 }
 0x69e   : > { %v1682_v11 = vadd.f32 %v1531_v10, %v1386_v8  ;;  %v2212_v12 = vpop.f32.mrb[7].mxu1  ;;  %v2108_v10 = vld [vmem:[%s3616_s16] ss:$0 sm:$0xff] (!%p2105_p9) }
 0x69f   : > { %v2109_v12 = vld [vmem:[%s3617_s4] ss:$0 sm:$0xff] (!%p2105_p9) }
 0x6a0   : > { %1686 = vst.msk [vmem:[#allocation5 + $0x8] sm:$0xff] %vm967_vm6, %v1682_v11 }
 0x6a1   : > { %v1604_v16 = vpop.f32.mrb[8].mxu0 }
 0x6a2   : > { %v1683_v17 = vadd.f32 %v1604_v16, %v1387_v13  ;;  %v2217_v18 = vpop.f32.mrb[9].mxu0  ;;  %1696 = sbr.rel (%p2105_p9) target bundleno = 2432 (0x980), region = 112 }
 0x6a4   : > { %1687 = vst.msk [vmem:[#allocation5 + $0x10] sm:$0xff] %vm967_vm6, %v1683_v17 }
 0x6a5   : > { %v1677_v20 = vpop.f32.mrb[8].mxu1 }
 0x6a6   : > { %v1684_v21 = vadd.f32 %v1677_v20, %v1388_v19  ;;  %v2222_v22 = vpop.f32.mrb[9].mxu1 }
 0x6a7   : > { %v1698_v41 = vld [vmem:[#allocation5 + $0x8] sm:$0xff] (!%p2105_p9) }
 0x6a8   : > { %1688 = vst.msk [vmem:[#allocation5 + $0x18] sm:$0xff] %vm967_vm6, %v1684_v21 }
 0x6ab   : > { %v1699_v45 = vld [vmem:[#allocation5 + $0x10] sm:$0xff] }
 0x6af   : > { %v1700_v43 = vld [vmem:[#allocation5 + $0x18] sm:$0xff] }
 0x6ed   : > { %v1717_v42 = vpop.permute.xlu0 %1716 }
 0x6ee   : > { %v1730_v25 = vmul.f32 %v1717_v42, %v1698_v41 }
 0x6f0   : > { %1734 = vrot.lane.b32.xlu0 %v1730_v25, %s2834_s1 }
 0x6f5   : > { %v1727_v44 = vpop.permute.xlu1 %1726 }
 0x6f6   : > { %v1732_v46 = vmul.f32 %v1727_v44, %v1700_v43  ;;  %v1722_v47 = vpop.permute.xlu0 %1721 }
 0x6f7   : > { %v1731_v48 = vmul.f32 %v1722_v47, %v1699_v45 }
 0x6f8   : > { %1742 = vrot.lane.b32.xlu0 %v1732_v46, %s2836_s12 }
 0x6f9   : > { %1738 = vrot.lane.b32.xlu1 %v1731_v48, %s2835_s29  ;;  %v1712_v49 = vpop.permute.xlu1 %1711 }
 0x6fa   : > { %v1729_v52 = vmul.f32 %v1712_v49, %v1697_v50 }
 0x762   : > { %v1735_v51 = vpop.permute.xlu0 %1734 }
 0x763   : > { %v1745_v53 = vsel %vm967_vm6, %v1729_v52, %v1735_v51 }
 0x76a   : > { %v1743_v55 = vpop.permute.xlu0 %1742 }
 0x76b   : > { %v1739_v54 = vpop.permute.xlu1 %1738 }
 0x76c   : > { %v1747_v56 = vsel %vm1746_vm9, %v1745_v53, %v1739_v54 }
 0x76d   : > { %v1749_v57 = vsel %vm1748_vm10, %v1747_v56, %v1743_v55 }
 0x76e   : > { %2232 = vmatmul.mubr.msk.f32.vlgmr.msra.gmra.mrb[0].mxu0 %vm788_vm5, %v1749_v57 }
 0x841   : > { %v1830_v59 = vpop.f32.mrb[0].mxu0 }
 0x842   : > { %v1831_v61 = vadd.f32 %v2106_v58, %v1830_v59  ;;  %v2233_v62 = vpop.f32.mrb[1].mxu0 }
 0x844   : > { %v1835_v63 = vadd.f32 %v1834_v60, %v1831_v61 }
 0x846   : > { %v1836_v0 = vsel %vm788_vm5, %v1835_v63, 0.0 }
 0x847   : > { %1837 = vadd.xlane.f32.xlu1 %v1836_v0 }
 0x8d4   : > { %v1838_v1 = vpop.xlane.xlu1 %1837 }
 0x8d5   : > { %v1840_v2 = vmul.f32 0.03125, %v1838_v1 }
 0x8d7   : > { %v1841_v3 = vsub.f32 %v1835_v63, %v1840_v2 }
 0x8d9   : > { %v1842_v4 = vmul.f32 %v1841_v3, %v1841_v3 }
 0x8db   : > { %v1843_v5 = vsel %vm788_vm5, %v1842_v4, 0.0 }
 0x8dc   : > { %1844 = vadd.xlane.f32.xlu0 %v1843_v5 }
 0x969   : > { %v1845_v6 = vpop.xlane.xlu0 %1844 }
 0x96a   : > { %v1846_v7 = vmul.f32 0.03125, %v1845_v6 }
 0x96c   : > { %v1847_v8 = vadd.f32 1e-05, %v1846_v7 }
 0x96e   : > { %2457 = vrsqrt.f32 %v1847_v8 }
 0x978   : > { %v2458_v9 = vpop.eup %2457 }
 0x979   : > { %v1849_v11 = vmul.f32 %v2458_v9, %v1841_v3 }
 0x97b   : > { %v1857_v13 = vmul.f32 %v2108_v10, %v1849_v11 }
 0x97d   : > { %v1865_v14 = vadd.f32 %v2109_v12, %v1857_v13 }
 0x97f   : > { %1866 = vst.msk [vmem:[%s653_s11] sm:$0xff] %vm788_vm5, %v1865_v14 }
 0x980 PF: > { %s3618_s27 = sld [smem:[#allocation28_spill]]  ;;  %s3619_s29 = sld [smem:[#allocation46_spill]] }
 0x981   : > { %s1881_s9 = sshll.u32 %s653_s11, 4  ;;  %s1868_s24 = scalar_lea.sflag [#allocation8], %s3272_s8  ;;  %s1882_s9 = int_to_ptr.vmem [resolvable:$true] %s1881_s9 }
 0x982   : > { %s2663_s20 = scalar_lea.vmem %s1882_s9, 128  ;;  %p3621_p7 = scmp.ne.s32.totalorder %s3580_s13, 0 }
 0x983   : > { %p2664_p8 = scmp.ne.s32.totalorder %s1882_s9, %s2663_s20  ;;  %s2837_s26 = smov [#allocation18]  }
 0x984   : > { %s2667_s16 = sshll.u32 %s2837_s26, 4  ;;  %s2668_s16 = int_to_ptr.vmem [resolvable:$false] %s2667_s16 }
 0x985   : > { %p2665_p13 = pnand %p2664_p8, %p3621_p7  ;;  %s2669_s7 = scalar_lea.vmem %s2668_s16, 256 }
 0x986   : > { %s2111_s25 = sshll.u32 %s3618_s27, 7  ;;  %s3620_s12 = smov %s3619_s29 }
 0x987   : > { %s3456_s5 = scalar_lea.hbm %s3619_s29, %s2111_s25  ;;  %p2666_p2 = pneg %p2665_p13 }
 0x988   : > { %p2670_p11 = scmp.lt.s32.totalorder %s1882_s9, %s2668_s16  ;;  %p2671_p1 = scmp.lt.s32.totalorder %s2669_s7, %s2663_s20 }
 0x98a   : > { %p2672_p0 = por %p2671_p1, %p2670_p11 }
 0x98c   : > { %p2673_p12 = pnand %p2672_p0, %p2666_p2 }
 0x98e   : > { %2676 = shalt.err (!%p2673_p12)
}
 0x98f   : > { %s2677_s8 = scalar_lea.hbm %s3456_s5, 128  ;;  %s2681_s0 = scalar_lea.hbm %s3620_s12, 256 }
 0x990   : > { %p2678_p6 = scmp.ne.s32.totalorder %s3456_s5, %s2677_s8  ;;  %p2682_p10 = scmp.lt.u32.totalorder %s3456_s5, %s3620_s12 }
 0x991   : > { %p2683_p3 = scmp.lt.u32.totalorder %s2681_s0, %s2677_s8  ;;  %p2685_p8 = scmp.lt.u32.totalorder %s2677_s8, %s3456_s5 }
 0x992   : > { %p2679_p4 = pnand %p2678_p6, %p3621_p7 }
 0x993   : > { %p2684_p9 = por %p2683_p3, %p2682_p10 }
 0x994   : > { %p2680_p5 = pneg %p2679_p4 }
 0x995   : > { %p2686_p13 = por %p2685_p8, %p2684_p9 }
 0x997   : > { %p2687_p2 = pnand %p2686_p13, %p2680_p5 }
 0x999   : > { %2690 = shalt.err (!%p2687_p2)
}
 0x99a   : > { %2278 = dma.vmem_to_hbm [thread:$0]  (%p3621_p7), %s1882_s9, 128, %s3456_s5, %s1868_s24  }
 0x99b PF: > { %s3622_s25 = sld [smem:[#allocation26_spill]]  ;;  %s3623_s28 = sld [smem:[#allocation32_spill]] }
 0x99c   : > { %p2314_p11 = scmp.ge.s32.totalorder %s2805_s23, 2 }
 0x9a1   : > { %s1893_s1 = sand.u32 1, %s3622_s25   ;;  %p3624_p1 = scmp.ne.s32.totalorder %s3623_s28, 0 }
 0x9a2   : > { %s1894_s29 = scalar_lea.sflag [#allocation8], %s1893_s1 }
 0x9a3   : > { %p2304_p0 = pnand %p2314_p11, %p3624_p1 }
 0x9a5   : > { %2760 = dma.done.wait (!%p2304_p0), %s1894_s29, 128  }
 0x9a6   : > { %2762 = vsyncadd (!%p2304_p0), %s1894_s29, 4294967168  ;;  %s37_s23 = sadd.s32 1, %s2805_s23   ;;  %s3625_s13 = sld [smem:[#allocation29_spill]] }
 0x9a7   : > { %p34_p12 = scmp.ge.s32.totalorder %s37_s23, 6   ;;  %s3626_s21 = sld [smem:[#allocation33_spill]] }
 0x9a8   : > { %s3627_s5 = smov %s3642_s19  ;;  %s3628_s29 = smov %s2769_s30 }
 0x9a9   : > { %s3629_s30 = smov %s2773_s15  ;;  %s3630_s15 = smov %s3219_s10 }
 0x9aa   : > { %s3631_s16 = smov %s2781_s17  ;;  %s3632_s17 = smov %s2785_s18 }
 0x9ab   : > { %s3633_s18 = smov %s3216_s6  ;;  %s3635_s20 = smov %s2801_s22 }
 0x9ac   : > { %s3634_s19 = smov %s3625_s13  ;;  %s3636_s22 = smov %s3627_s5 }
 0x9ad   :  { %36 = sbr.rel (!%p34_p12) target bundleno = 28 (0x1c), region = 178 }
 0x9b4   :  { %1899 = vsyncpa [#allocation7], 1 }
 0x9b5   :  { %1901 = vsyncpa [#allocation7 + $0x1], 1 }
 0x9b6   :  { %1902 = vsyncpa [#allocation10], 1 }
 0x9b7   :  { %1904 = vsyncpa [#allocation10 + $0x1], 1 }
 0x9b8   :  { %1905 = vsyncpa [#allocation13], 1 }
 0x9b9   :  { %1907 = vsyncpa [#allocation13 + $0x1], 1 }
 0x9ba   :  { %1908 = vsyncpa [#allocation16], 1 }
 0x9bb   :  { %1909 = vsyncpa [#allocation8], 1 }
 0x9bc   :  { %1911 = vsyncpa [#allocation8 + $0x1], 1 }

</bundles_post_ra>
